<compile_context>
chip_gen: v6e
topology: v6e:2x2x1
jax: 0.10.0
libtpu: 0.0.40
codegen_flags: <defaults>
</compile_context>

<pallas_src>
import math

import jax
import jax.numpy as jnp
from jax.experimental import pallas as pl
from jax.experimental.pallas import tpu as pltpu


# ----------------------------------------------------------------------------
# Fused kernel factory: embedded sequence -> num_layers LSTM -> fc -> softmax.
# Gate order INSIDE the kernel is [i, f, o, g] (columns permuted in wrapper).
# ----------------------------------------------------------------------------
def _make_fused_kernel(S, Bp, H, num_layers, unroll):
    H3 = 3 * H

    def kernel(*refs):
        # refs layout:
        #   [0]                     x_ref      (S*Bp, E)        f32
        #   [1+3l, 2+3l, 3+3l]      w_ih, w_hh, b   per layer (gate-permuted)
        #   [1+3L]                  w_fc       (H, Op)
        #   [2+3L]                  b_fc       (1, Op)  (pads = -1e30)
        #   [3+3L]                  out_ref    (Bp, Op)
        #   [4+3L ...]              xproj ping-pong scratch (S*Bp, 4H), 1 or 2
        x_ref = refs[0]
        layer_refs = [
            (refs[1 + 3 * l], refs[2 + 3 * l], refs[3 + 3 * l])
            for l in range(num_layers)
        ]
        base = 1 + 3 * num_layers
        wfc_ref, bfc_ref, out_ref = refs[base], refs[base + 1], refs[base + 2]
        scratch = refs[base + 3:]
        xp = [scratch[0], scratch[1] if num_layers > 1 else scratch[0]]

        # Layer 0: hoisted input projection for ALL timesteps (one big MXU
        # matmul) instead of S tiny ones on the recurrence's critical path.
        xp[0][...] = (
            jnp.dot(x_ref[...], layer_refs[0][0][...],
                    preferred_element_type=jnp.float32)
            + layer_refs[0][2][...]
        )

        def run_layer(xp_in_ref, xp_out_ref, w_hh_ref, w_ih_next_ref, b_next_ref):
            w_hh = w_hh_ref[...]                      # loop-invariant
            write_next = w_ih_next_ref is not None
            if write_next:
                w_in = w_ih_next_ref[...]
                b_in = b_next_ref[...]

            def step(t, carry):
                h_prev, c_prev = carry
                off = pl.multiple_of(t * Bp, Bp)
                gates = xp_in_ref[pl.ds(off, Bp), :] + jnp.dot(
                    h_prev, w_hh, preferred_element_type=jnp.float32
                )                                      # (Bp, 4H), [i,f,o,g]
                sig = jax.nn.sigmoid(gates[:, :H3])    # i, f, o  (3H)
                g_g = jnp.tanh(gates[:, H3:])          # g        (H)
                i_g = sig[:, 0 * H:1 * H]
                f_g = sig[:, 1 * H:2 * H]
                o_g = sig[:, 2 * H:3 * H]
                c_new = f_g * c_prev + i_g * g_g
                h_new = o_g * jnp.tanh(c_new)
                if write_next:
                    # Lane-dense (Bp, 4H) store: next layer's input projection
                    # computed incrementally; off the recurrent critical path.
                    xp_out_ref[pl.ds(off, Bp), :] = (
                        jnp.dot(h_new, w_in, preferred_element_type=jnp.float32)
                        + b_in
                    )
                return h_new, c_new

            h0 = jnp.zeros((Bp, H), jnp.float32)
            c0 = jnp.zeros((Bp, H), jnp.float32)
            h_last, _ = jax.lax.fori_loop(0, S, step, (h0, c0), unroll=unroll)
            return h_last

        h_final = None
        cur = 0
        for l in range(num_layers):
            last = l == num_layers - 1
            w_hh_ref = layer_refs[l][1]
            w_ih_next_ref = None if last else layer_refs[l + 1][0]
            b_next_ref = None if last else layer_refs[l + 1][2]
            h_final = run_layer(xp[cur], xp[1 - cur], w_hh_ref,
                                w_ih_next_ref, b_next_ref)
            cur = 1 - cur

        # fc(hidden[-1]) + softmax(dim=1) fused, lane-dense epilogue.
        logits = (
            jnp.dot(h_final, wfc_ref[...], preferred_element_type=jnp.float32)
            + bfc_ref[...]
        )                                              # (Bp, Op); pads ~ -1e30
        m = jnp.max(logits, axis=1, keepdims=True)
        e = jnp.exp(logits - m)
        denom = jnp.sum(e, axis=1, keepdims=True)
        out_ref[...] = (e / denom).astype(out_ref.dtype)   # exact probabilities

    return kernel


# ----------------------------------------------------------------------------
# Parameter construction (deterministic, PyTorch-like init, PyTorch gate order
# [i, f, g, o]).  Weights are stored pre-transposed for right-multiplication:
# w_ih (in, 4H), w_hh (H, 4H), fc (H, O).
# ----------------------------------------------------------------------------
def init_params(key, vocab_size, embed_size, hidden_size, output_size, num_layers):
    keys = jax.random.split(key, 2 + 4 * num_layers + 2)
    k_iter = iter(keys)

    params = {}
    params["embedding"] = jax.random.normal(
        next(k_iter), (vocab_size, embed_size), dtype=jnp.float32
    )

    stdv = 1.0 / math.sqrt(hidden_size)
    lstm_layers = []
    for layer in range(num_layers):
        in_size = embed_size if layer == 0 else hidden_size
        w_ih = jax.random.uniform(
            next(k_iter), (in_size, 4 * hidden_size), jnp.float32, -stdv, stdv
        )
        w_hh = jax.random.uniform(
            next(k_iter), (hidden_size, 4 * hidden_size), jnp.float32, -stdv, stdv
        )
        b_ih = jax.random.uniform(
            next(k_iter), (4 * hidden_size,), jnp.float32, -stdv, stdv
        )
        b_hh = jax.random.uniform(
            next(k_iter), (4 * hidden_size,), jnp.float32, -stdv, stdv
        )
        lstm_layers.append(
            {"w_ih": w_ih, "w_hh": w_hh, "b": (b_ih + b_hh).reshape(1, -1)}
        )
    params["lstm"] = lstm_layers

    params["fc_w"] = jax.random.uniform(
        next(k_iter), (hidden_size, output_size), jnp.float32, -stdv, stdv
    )
    params["fc_b"] = jax.random.uniform(
        next(k_iter), (1, output_size), jnp.float32, -stdv, stdv
    )
    return params


def _permute_gates(w):
    """PyTorch gate order [i, f, g, o] -> kernel order [i, f, o, g] (last dim)."""
    H = w.shape[-1] // 4
    return jnp.concatenate(
        [w[..., : 2 * H], w[..., 3 * H:], w[..., 2 * H: 3 * H]], axis=-1
    )


def _round_up(x, m):
    return (x + m - 1) // m * m


def _vmem_bytes_2d(shape, itemsize=4):
    r, c = shape
    return _round_up(r, 8) * _round_up(c, 128) * itemsize


# ----------------------------------------------------------------------------
# Full forward: embedding gather is XLA glue; everything else is one Pallas call.
# attention_mask is unused by the PyTorch forward; kept for signature parity.
# ----------------------------------------------------------------------------
@jax.jit
def lstm_model_forward(params, input_ids, attention_mask):
    del attention_mask
    B, S = input_ids.shape
    E = params["embedding"].shape[1]
    H = params["lstm"][0]["w_hh"].shape[0]
    O = params["fc_w"].shape[1]
    num_layers = len(params["lstm"])
    Bp = ((B + 7) // 8) * 8            # pad batch to a sublane multiple
    Op = max(128, _round_up(O, 128))   # lane-dense fc/softmax epilogue

    # Embedding lookup (glue), time-major layout, batch padded, flattened so the
    # hoisted input projection is a single (S*Bp, E) x (E, 4H) matmul.
    embedded = jnp.take(params["embedding"], input_ids, axis=0)   # (B, S, E)
    x = jnp.transpose(embedded, (1, 0, 2))                        # (S, B, E)
    x = jnp.pad(x, ((0, 0), (0, Bp - B), (0, 0)))                 # (S, Bp, E)
    x = x.reshape(S * Bp, E).astype(jnp.float32)

    # Gate permutation (free, once per call) + fc output padding.
    args = [x]
    for lp in params["lstm"]:
        args += [_permute_gates(lp["w_ih"]), _permute_gates(lp["w_hh"]),
                 _permute_gates(lp["b"])]
    fc_w = jnp.pad(params["fc_w"], ((0, 0), (0, Op - O)))
    fc_b = jnp.pad(params["fc_b"], ((0, 0), (0, Op - O)),
                   mode="constant", constant_values=-1e30)
    args += [fc_w, fc_b]

    n_xproj = 2 if num_layers > 1 else 1
    scratch_shapes = [pltpu.VMEM((S * Bp, 4 * H), jnp.float32)
                      for _ in range(n_xproj)]

    # Explicit scoped-VMEM budget (default 16/32 MiB is easy to exceed).
    resident = [(S * Bp, E)]
    for l in range(num_layers):
        in_size = E if l == 0 else H
        resident += [(in_size, 4 * H), (H, 4 * H), (1, 4 * H)]
    resident += [(H, Op), (1, Op), (Bp, Op)]
    resident += [(S * Bp, 4 * H)] * n_xproj
    total = sum(_vmem_bytes_2d(s) for s in resident)
    vmem_limit = int(min(max(2 * total + (4 << 20), 32 << 20), 64 << 20))

    unroll = True if S <= 8 else 8

    # TODO(synk): nn.LSTM inter-layer dropout is a train-time op; this eval
    # forward skips it (matches module.eval()).
    kernel = _make_fused_kernel(S, Bp, H, num_layers, unroll)
    vspec = pl.BlockSpec(memory_space=pltpu.MemorySpace.VMEM)
    out = pl.pallas_call(
        kernel,
        out_shape=jax.ShapeDtypeStruct((Bp, Op), jnp.float32),
        in_specs=[vspec] * len(args),
        out_specs=vspec,
        scratch_shapes=scratch_shapes,
        compiler_params=pltpu.CompilerParams(vmem_limit_bytes=vmem_limit),
    )(*args)
    return out[:B, :O]


# ----------------------------------------------------------------------------
# Pure-JAX reference (PyTorch gate order) for a correctness check in __main__.
# ----------------------------------------------------------------------------
def _forward_ref(params, input_ids):
    x = jnp.take(params["embedding"], input_ids, axis=0)  # (B, S, E)
    B, S, _ = x.shape
    h = None
    for lp in params["lstm"]:
        H = lp["w_hh"].shape[0]
        h = jnp.zeros((B, H), jnp.float32)
        c = jnp.zeros((B, H), jnp.float32)
        outs = []
        for t in range(S):
            gates = x[:, t, :] @ lp["w_ih"] + h @ lp["w_hh"] + lp["b"]
            i = jax.nn.sigmoid(gates[:, 0 * H:1 * H])
            f = jax.nn.sigmoid(gates[:, 1 * H:2 * H])
            g = jnp.tanh(gates[:, 2 * H:3 * H])
            o = jax.nn.sigmoid(gates[:, 3 * H:4 * H])
            c = f * c + i * g
            h = o * jnp.tanh(c)
            outs.append(h)
        x = jnp.stack(outs, axis=1)
    logits = h @ params["fc_w"] + params["fc_b"]
    return jax.nn.softmax(logits, axis=1)


if __name__ == "__main__":
    vocab_size = 50
    embed_size = 16
    hidden_size = 32
    output_size = 8
    num_layers = 2

    B, S = 2, 8

    key = jax.random.PRNGKey(0)
    k_params, k_ids = jax.random.split(key)

    params = init_params(
        k_params, vocab_size, embed_size, hidden_size, output_size, num_layers
    )
    input_ids = jax.random.randint(k_ids, (B, S), 0, vocab_size, dtype=jnp.int32)
    attention_mask = jnp.ones((B, S), dtype=jnp.int32)

    out = lstm_model_forward(params, input_ids, attention_mask)
    out = jax.block_until_ready(out)

    ref = _forward_ref(params, input_ids)

    assert out.shape == (B, output_size)
    assert bool(jnp.all(jnp.isfinite(out)))
    # exact-division softmax: rows sum to ~1 tightly
    assert bool(jnp.allclose(jnp.sum(out, axis=1), 1.0, atol=1e-4))
    assert bool(jnp.allclose(out, ref, atol=2e-2)), "mismatch vs pure-JAX reference"

    print("KERNEL_OK")
</pallas_src>

<mosaic_0001>
module attributes {stable_mosaic.version = 11 : i64} {
  func.func @kernel(%arg0: memref<64x16xf32, #tpu.memory_space<vmem>>, %arg1: memref<16x128xf32, #tpu.memory_space<vmem>>, %arg2: memref<32x128xf32, #tpu.memory_space<vmem>>, %arg3: memref<1x128xf32, #tpu.memory_space<vmem>>, %arg4: memref<32x128xf32, #tpu.memory_space<vmem>>, %arg5: memref<32x128xf32, #tpu.memory_space<vmem>>, %arg6: memref<1x128xf32, #tpu.memory_space<vmem>>, %arg7: memref<32x128xf32, #tpu.memory_space<vmem>>, %arg8: memref<1x128xf32, #tpu.memory_space<vmem>>, %arg9: memref<8x128xf32, #tpu.memory_space<vmem>>, %arg10: memref<64x128xf32, #tpu.memory_space<vmem>>, %arg11: memref<64x128xf32, #tpu.memory_space<vmem>>) attributes {dimension_semantics = [], scalar_prefetch = 0 : i64, scratch_operands = 2 : i64, tpu.core_type = #tpu.core_type<tc>} {
    %c0 = arith.constant 0 : index
    %c0_0 = arith.constant 0 : index
    %0 = vector.load %arg0[%c0, %c0_0] : memref<64x16xf32, #tpu.memory_space<vmem>>, vector<64x16xf32>
    %c0_1 = arith.constant 0 : index
    %c0_2 = arith.constant 0 : index
    %1 = vector.load %arg1[%c0_1, %c0_2] : memref<16x128xf32, #tpu.memory_space<vmem>>, vector<16x128xf32>
    %cst = arith.constant dense<0.000000e+00> : vector<64x128xf32>
    %2 = tpu.matmul %0, %1, %cst {dimension_numbers = #tpu.dot_dimension_numbers<[1], [0], [0], [1], [0, 0, 1, 1], [], []>} : vector<64x16xf32>, vector<16x128xf32>, vector<64x128xf32> -> vector<64x128xf32>
    %c0_3 = arith.constant 0 : index
    %c0_4 = arith.constant 0 : index
    %3 = vector.load %arg3[%c0_3, %c0_4] : memref<1x128xf32, #tpu.memory_space<vmem>>, vector<1x128xf32>
    %4 = vector.broadcast %3 : vector<1x128xf32> to vector<64x128xf32>
    %5 = arith.addf %2, %4 : vector<64x128xf32>
    %c0_5 = arith.constant 0 : index
    %c0_6 = arith.constant 0 : index
    %6 = vector.load %arg10[%c0_5, %c0_6] : memref<64x128xf32, #tpu.memory_space<vmem>>, vector<64x128xf32>
    tpu.vector_store %arg10[%c0_5, %c0_6], %5 {strides = array<i32>} : memref<64x128xf32, #tpu.memory_space<vmem>>, vector<64x128xf32>,
    %c0_7 = arith.constant 0 : index
    %c0_8 = arith.constant 0 : index
    %7 = vector.load %arg2[%c0_7, %c0_8] : memref<32x128xf32, #tpu.memory_space<vmem>>, vector<32x128xf32>
    %c0_9 = arith.constant 0 : index
    %c0_10 = arith.constant 0 : index
    %8 = vector.load %arg4[%c0_9, %c0_10] : memref<32x128xf32, #tpu.memory_space<vmem>>, vector<32x128xf32>
    %c0_11 = arith.constant 0 : index
    %c0_12 = arith.constant 0 : index
    %9 = vector.load %arg6[%c0_11, %c0_12] : memref<1x128xf32, #tpu.memory_space<vmem>>, vector<1x128xf32>
    %cst_13 = arith.constant 0.000000e+00 : f32
    %10 = vector.broadcast %cst_13 : f32 to vector<8x32xf32>
    %cst_14 = arith.constant 0.000000e+00 : f32
    %11 = vector.broadcast %cst_14 : f32 to vector<8x32xf32>
    %c0_i32 = arith.constant 0 : i32
    %c8_i32 = arith.constant 8 : i32
    %12 = arith.muli %c0_i32, %c8_i32 : i32
    %13 = tpu.assume_multiple %12, 8 : i32
    %14 = arith.index_cast %13 : i32 to index
    %c0_15 = arith.constant 0 : index
    %15 = vector.load %arg10[%14, %c0_15] : memref<64x128xf32, #tpu.memory_space<vmem>>, vector<8x128xf32>
    %cst_16 = arith.constant dense<0.000000e+00> : vector<8x128xf32>
    %16 = tpu.matmul %10, %7, %cst_16 {dimension_numbers = #tpu.dot_dimension_numbers<[1], [0], [0], [1], [0, 0, 1, 1], [], []>} : vector<8x32xf32>, vector<32x128xf32>, vector<8x128xf32> -> vector<8x128xf32>
    %17 = arith.addf %15, %16 : vector<8x128xf32>
    %18 = vector.extract_strided_slice %17 {offsets = [0, 0], sizes = [8, 96], strides = [1, 1]} : vector<8x128xf32> to vector<8x96xf32>
    %19 = arith.negf %18 : vector<8x96xf32>
    %20 = math.exp %19 : vector<8x96xf32>
    %cst_17 = arith.constant 1.000000e+00 : f32
    %21 = vector.broadcast %cst_17 : f32 to vector<8x96xf32>
    %22 = arith.addf %21, %20 : vector<8x96xf32>
    %23 = arith.divf %21, %22 : vector<8x96xf32>
    %24 = vector.extract_strided_slice %17 {offsets = [0, 96], sizes = [8, 32], strides = [1, 1]} : vector<8x128xf32> to vector<8x32xf32>
    %25 = math.tanh %24 : vector<8x32xf32>
    %26 = vector.extract_strided_slice %23 {offsets = [0, 0], sizes = [8, 32], strides = [1, 1]} : vector<8x96xf32> to vector<8x32xf32>
    %27 = vector.extract_strided_slice %23 {offsets = [0, 32], sizes = [8, 32], strides = [1, 1]} : vector<8x96xf32> to vector<8x32xf32>
    %28 = vector.extract_strided_slice %23 {offsets = [0, 64], sizes = [8, 32], strides = [1, 1]} : vector<8x96xf32> to vector<8x32xf32>
    %29 = arith.mulf %27, %11 : vector<8x32xf32>
    %30 = arith.mulf %26, %25 : vector<8x32xf32>
    %31 = arith.addf %29, %30 : vector<8x32xf32>
    %32 = math.tanh %31 : vector<8x32xf32>
    %33 = arith.mulf %28, %32 : vector<8x32xf32>
    %cst_18 = arith.constant dense<0.000000e+00> : vector<8x128xf32>
    %34 = tpu.matmul %33, %8, %cst_18 {dimension_numbers = #tpu.dot_dimension_numbers<[1], [0], [0], [1], [0, 0, 1, 1], [], []>} : vector<8x32xf32>, vector<32x128xf32>, vector<8x128xf32> -> vector<8x128xf32>
    %35 = vector.broadcast %9 : vector<1x128xf32> to vector<8x128xf32>
    %36 = arith.addf %34, %35 : vector<8x128xf32>
    %37 = arith.index_cast %13 : i32 to index
    %c0_19 = arith.constant 0 : index
    %38 = vector.load %arg11[%37, %c0_19] : memref<64x128xf32, #tpu.memory_space<vmem>>, vector<8x128xf32>
    tpu.vector_store %arg11[%37, %c0_19], %36 {strides = array<i32>} : memref<64x128xf32, #tpu.memory_space<vmem>>, vector<8x128xf32>,
    %c1_i32 = arith.constant 1 : i32
    %c8_i32_20 = arith.constant 8 : i32
    %39 = arith.muli %c1_i32, %c8_i32_20 : i32
    %40 = tpu.assume_multiple %39, 8 : i32
    %41 = arith.index_cast %40 : i32 to index
    %c0_21 = arith.constant 0 : index
    %42 = vector.load %arg10[%41, %c0_21] : memref<64x128xf32, #tpu.memory_space<vmem>>, vector<8x128xf32>
    %cst_22 = arith.constant dense<0.000000e+00> : vector<8x128xf32>
    %43 = tpu.matmul %33, %7, %cst_22 {dimension_numbers = #tpu.dot_dimension_numbers<[1], [0], [0], [1], [0, 0, 1, 1], [], []>} : vector<8x32xf32>, vector<32x128xf32>, vector<8x128xf32> -> vector<8x128xf32>
    %44 = arith.addf %42, %43 : vector<8x128xf32>
    %45 = vector.extract_strided_slice %44 {offsets = [0, 0], sizes = [8, 96], strides = [1, 1]} : vector<8x128xf32> to vector<8x96xf32>
    %46 = arith.negf %45 : vector<8x96xf32>
    %47 = math.exp %46 : vector<8x96xf32>
    %cst_23 = arith.constant 1.000000e+00 : f32
    %48 = vector.broadcast %cst_23 : f32 to vector<8x96xf32>
    %49 = arith.addf %48, %47 : vector<8x96xf32>
    %50 = arith.divf %48, %49 : vector<8x96xf32>
    %51 = vector.extract_strided_slice %44 {offsets = [0, 96], sizes = [8, 32], strides = [1, 1]} : vector<8x128xf32> to vector<8x32xf32>
    %52 = math.tanh %51 : vector<8x32xf32>
    %53 = vector.extract_strided_slice %50 {offsets = [0, 0], sizes = [8, 32], strides = [1, 1]} : vector<8x96xf32> to vector<8x32xf32>
    %54 = vector.extract_strided_slice %50 {offsets = [0, 32], sizes = [8, 32], strides = [1, 1]} : vector<8x96xf32> to vector<8x32xf32>
    %55 = vector.extract_strided_slice %50 {offsets = [0, 64], sizes = [8, 32], strides = [1, 1]} : vector<8x96xf32> to vector<8x32xf32>
    %56 = arith.mulf %54, %31 : vector<8x32xf32>
    %57 = arith.mulf %53, %52 : vector<8x32xf32>
    %58 = arith.addf %56, %57 : vector<8x32xf32>
    %59 = math.tanh %58 : vector<8x32xf32>
    %60 = arith.mulf %55, %59 : vector<8x32xf32>
    %cst_24 = arith.constant dense<0.000000e+00> : vector<8x128xf32>
    %61 = tpu.matmul %60, %8, %cst_24 {dimension_numbers = #tpu.dot_dimension_numbers<[1], [0], [0], [1], [0, 0, 1, 1], [], []>} : vector<8x32xf32>, vector<32x128xf32>, vector<8x128xf32> -> vector<8x128xf32>
    %62 = vector.broadcast %9 : vector<1x128xf32> to vector<8x128xf32>
    %63 = arith.addf %61, %62 : vector<8x128xf32>
    %64 = arith.index_cast %40 : i32 to index
    %c0_25 = arith.constant 0 : index
    %65 = vector.load %arg11[%64, %c0_25] : memref<64x128xf32, #tpu.memory_space<vmem>>, vector<8x128xf32>
    tpu.vector_store %arg11[%64, %c0_25], %63 {strides = array<i32>} : memref<64x128xf32, #tpu.memory_space<vmem>>, vector<8x128xf32>,
    %c2_i32 = arith.constant 2 : i32
    %c8_i32_26 = arith.constant 8 : i32
    %66 = arith.muli %c2_i32, %c8_i32_26 : i32
    %67 = tpu.assume_multiple %66, 8 : i32
    %68 = arith.index_cast %67 : i32 to index
    %c0_27 = arith.constant 0 : index
    %69 = vector.load %arg10[%68, %c0_27] : memref<64x128xf32, #tpu.memory_space<vmem>>, vector<8x128xf32>
    %cst_28 = arith.constant dense<0.000000e+00> : vector<8x128xf32>
    %70 = tpu.matmul %60, %7, %cst_28 {dimension_numbers = #tpu.dot_dimension_numbers<[1], [0], [0], [1], [0, 0, 1, 1], [], []>} : vector<8x32xf32>, vector<32x128xf32>, vector<8x128xf32> -> vector<8x128xf32>
    %71 = arith.addf %69, %70 : vector<8x128xf32>
    %72 = vector.extract_strided_slice %71 {offsets = [0, 0], sizes = [8, 96], strides = [1, 1]} : vector<8x128xf32> to vector<8x96xf32>
    %73 = arith.negf %72 : vector<8x96xf32>
    %74 = math.exp %73 : vector<8x96xf32>
    %cst_29 = arith.constant 1.000000e+00 : f32
    %75 = vector.broadcast %cst_29 : f32 to vector<8x96xf32>
    %76 = arith.addf %75, %74 : vector<8x96xf32>
    %77 = arith.divf %75, %76 : vector<8x96xf32>
    %78 = vector.extract_strided_slice %71 {offsets = [0, 96], sizes = [8, 32], strides = [1, 1]} : vector<8x128xf32> to vector<8x32xf32>
    %79 = math.tanh %78 : vector<8x32xf32>
    %80 = vector.extract_strided_slice %77 {offsets = [0, 0], sizes = [8, 32], strides = [1, 1]} : vector<8x96xf32> to vector<8x32xf32>
    %81 = vector.extract_strided_slice %77 {offsets = [0, 32], sizes = [8, 32], strides = [1, 1]} : vector<8x96xf32> to vector<8x32xf32>
    %82 = vector.extract_strided_slice %77 {offsets = [0, 64], sizes = [8, 32], strides = [1, 1]} : vector<8x96xf32> to vector<8x32xf32>
    %83 = arith.mulf %81, %58 : vector<8x32xf32>
    %84 = arith.mulf %80, %79 : vector<8x32xf32>
    %85 = arith.addf %83, %84 : vector<8x32xf32>
    %86 = math.tanh %85 : vector<8x32xf32>
    %87 = arith.mulf %82, %86 : vector<8x32xf32>
    %cst_30 = arith.constant dense<0.000000e+00> : vector<8x128xf32>
    %88 = tpu.matmul %87, %8, %cst_30 {dimension_numbers = #tpu.dot_dimension_numbers<[1], [0], [0], [1], [0, 0, 1, 1], [], []>} : vector<8x32xf32>, vector<32x128xf32>, vector<8x128xf32> -> vector<8x128xf32>
    %89 = vector.broadcast %9 : vector<1x128xf32> to vector<8x128xf32>
    %90 = arith.addf %88, %89 : vector<8x128xf32>
    %91 = arith.index_cast %67 : i32 to index
    %c0_31 = arith.constant 0 : index
    %92 = vector.load %arg11[%91, %c0_31] : memref<64x128xf32, #tpu.memory_space<vmem>>, vector<8x128xf32>
    tpu.vector_store %arg11[%91, %c0_31], %90 {strides = array<i32>} : memref<64x128xf32, #tpu.memory_space<vmem>>, vector<8x128xf32>,
    %c3_i32 = arith.constant 3 : i32
    %c8_i32_32 = arith.constant 8 : i32
    %93 = arith.muli %c3_i32, %c8_i32_32 : i32
    %94 = tpu.assume_multiple %93, 8 : i32
    %95 = arith.index_cast %94 : i32 to index
    %c0_33 = arith.constant 0 : index
    %96 = vector.load %arg10[%95, %c0_33] : memref<64x128xf32, #tpu.memory_space<vmem>>, vector<8x128xf32>
    %cst_34 = arith.constant dense<0.000000e+00> : vector<8x128xf32>
    %97 = tpu.matmul %87, %7, %cst_34 {dimension_numbers = #tpu.dot_dimension_numbers<[1], [0], [0], [1], [0, 0, 1, 1], [], []>} : vector<8x32xf32>, vector<32x128xf32>, vector<8x128xf32> -> vector<8x128xf32>
    %98 = arith.addf %96, %97 : vector<8x128xf32>
    %99 = vector.extract_strided_slice %98 {offsets = [0, 0], sizes = [8, 96], strides = [1, 1]} : vector<8x128xf32> to vector<8x96xf32>
    %100 = arith.negf %99 : vector<8x96xf32>
    %101 = math.exp %100 : vector<8x96xf32>
    %cst_35 = arith.constant 1.000000e+00 : f32
    %102 = vector.broadcast %cst_35 : f32 to vector<8x96xf32>
    %103 = arith.addf %102, %101 : vector<8x96xf32>
    %104 = arith.divf %102, %103 : vector<8x96xf32>
    %105 = vector.extract_strided_slice %98 {offsets = [0, 96], sizes = [8, 32], strides = [1, 1]} : vector<8x128xf32> to vector<8x32xf32>
    %106 = math.tanh %105 : vector<8x32xf32>
    %107 = vector.extract_strided_slice %104 {offsets = [0, 0], sizes = [8, 32], strides = [1, 1]} : vector<8x96xf32> to vector<8x32xf32>
    %108 = vector.extract_strided_slice %104 {offsets = [0, 32], sizes = [8, 32], strides = [1, 1]} : vector<8x96xf32> to vector<8x32xf32>
    %109 = vector.extract_strided_slice %104 {offsets = [0, 64], sizes = [8, 32], strides = [1, 1]} : vector<8x96xf32> to vector<8x32xf32>
    %110 = arith.mulf %108, %85 : vector<8x32xf32>
    %111 = arith.mulf %107, %106 : vector<8x32xf32>
    %112 = arith.addf %110, %111 : vector<8x32xf32>
    %113 = math.tanh %112 : vector<8x32xf32>
    %114 = arith.mulf %109, %113 : vector<8x32xf32>
    %cst_36 = arith.constant dense<0.000000e+00> : vector<8x128xf32>
    %115 = tpu.matmul %114, %8, %cst_36 {dimension_numbers = #tpu.dot_dimension_numbers<[1], [0], [0], [1], [0, 0, 1, 1], [], []>} : vector<8x32xf32>, vector<32x128xf32>, vector<8x128xf32> -> vector<8x128xf32>
    %116 = vector.broadcast %9 : vector<1x128xf32> to vector<8x128xf32>
    %117 = arith.addf %115, %116 : vector<8x128xf32>
    %118 = arith.index_cast %94 : i32 to index
    %c0_37 = arith.constant 0 : index
    %119 = vector.load %arg11[%118, %c0_37] : memref<64x128xf32, #tpu.memory_space<vmem>>, vector<8x128xf32>
    tpu.vector_store %arg11[%118, %c0_37], %117 {strides = array<i32>} : memref<64x128xf32, #tpu.memory_space<vmem>>, vector<8x128xf32>,
    %c4_i32 = arith.constant 4 : i32
    %c8_i32_38 = arith.constant 8 : i32
    %120 = arith.muli %c4_i32, %c8_i32_38 : i32
    %121 = tpu.assume_multiple %120, 8 : i32
    %122 = arith.index_cast %121 : i32 to index
    %c0_39 = arith.constant 0 : index
    %123 = vector.load %arg10[%122, %c0_39] : memref<64x128xf32, #tpu.memory_space<vmem>>, vector<8x128xf32>
    %cst_40 = arith.constant dense<0.000000e+00> : vector<8x128xf32>
    %124 = tpu.matmul %114, %7, %cst_40 {dimension_numbers = #tpu.dot_dimension_numbers<[1], [0], [0], [1], [0, 0, 1, 1], [], []>} : vector<8x32xf32>, vector<32x128xf32>, vector<8x128xf32> -> vector<8x128xf32>
    %125 = arith.addf %123, %124 : vector<8x128xf32>
    %126 = vector.extract_strided_slice %125 {offsets = [0, 0], sizes = [8, 96], strides = [1, 1]} : vector<8x128xf32> to vector<8x96xf32>
    %127 = arith.negf %126 : vector<8x96xf32>
    %128 = math.exp %127 : vector<8x96xf32>
    %cst_41 = arith.constant 1.000000e+00 : f32
    %129 = vector.broadcast %cst_41 : f32 to vector<8x96xf32>
    %130 = arith.addf %129, %128 : vector<8x96xf32>
    %131 = arith.divf %129, %130 : vector<8x96xf32>
    %132 = vector.extract_strided_slice %125 {offsets = [0, 96], sizes = [8, 32], strides = [1, 1]} : vector<8x128xf32> to vector<8x32xf32>
    %133 = math.tanh %132 : vector<8x32xf32>
    %134 = vector.extract_strided_slice %131 {offsets = [0, 0], sizes = [8, 32], strides = [1, 1]} : vector<8x96xf32> to vector<8x32xf32>
    %135 = vector.extract_strided_slice %131 {offsets = [0, 32], sizes = [8, 32], strides = [1, 1]} : vector<8x96xf32> to vector<8x32xf32>
    %136 = vector.extract_strided_slice %131 {offsets = [0, 64], sizes = [8, 32], strides = [1, 1]} : vector<8x96xf32> to vector<8x32xf32>
    %137 = arith.mulf %135, %112 : vector<8x32xf32>
    %138 = arith.mulf %134, %133 : vector<8x32xf32>
    %139 = arith.addf %137, %138 : vector<8x32xf32>
    %140 = math.tanh %139 : vector<8x32xf32>
    %141 = arith.mulf %136, %140 : vector<8x32xf32>
    %cst_42 = arith.constant dense<0.000000e+00> : vector<8x128xf32>
    %142 = tpu.matmul %141, %8, %cst_42 {dimension_numbers = #tpu.dot_dimension_numbers<[1], [0], [0], [1], [0, 0, 1, 1], [], []>} : vector<8x32xf32>, vector<32x128xf32>, vector<8x128xf32> -> vector<8x128xf32>
    %143 = vector.broadcast %9 : vector<1x128xf32> to vector<8x128xf32>
    %144 = arith.addf %142, %143 : vector<8x128xf32>
    %145 = arith.index_cast %121 : i32 to index
    %c0_43 = arith.constant 0 : index
    %146 = vector.load %arg11[%145, %c0_43] : memref<64x128xf32, #tpu.memory_space<vmem>>, vector<8x128xf32>
    tpu.vector_store %arg11[%145, %c0_43], %144 {strides = array<i32>} : memref<64x128xf32, #tpu.memory_space<vmem>>, vector<8x128xf32>,
    %c5_i32 = arith.constant 5 : i32
    %c8_i32_44 = arith.constant 8 : i32
    %147 = arith.muli %c5_i32, %c8_i32_44 : i32
    %148 = tpu.assume_multiple %147, 8 : i32
    %149 = arith.index_cast %148 : i32 to index
    %c0_45 = arith.constant 0 : index
    %150 = vector.load %arg10[%149, %c0_45] : memref<64x128xf32, #tpu.memory_space<vmem>>, vector<8x128xf32>
    %cst_46 = arith.constant dense<0.000000e+00> : vector<8x128xf32>
    %151 = tpu.matmul %141, %7, %cst_46 {dimension_numbers = #tpu.dot_dimension_numbers<[1], [0], [0], [1], [0, 0, 1, 1], [], []>} : vector<8x32xf32>, vector<32x128xf32>, vector<8x128xf32> -> vector<8x128xf32>
    %152 = arith.addf %150, %151 : vector<8x128xf32>
    %153 = vector.extract_strided_slice %152 {offsets = [0, 0], sizes = [8, 96], strides = [1, 1]} : vector<8x128xf32> to vector<8x96xf32>
    %154 = arith.negf %153 : vector<8x96xf32>
    %155 = math.exp %154 : vector<8x96xf32>
    %cst_47 = arith.constant 1.000000e+00 : f32
    %156 = vector.broadcast %cst_47 : f32 to vector<8x96xf32>
    %157 = arith.addf %156, %155 : vector<8x96xf32>
    %158 = arith.divf %156, %157 : vector<8x96xf32>
    %159 = vector.extract_strided_slice %152 {offsets = [0, 96], sizes = [8, 32], strides = [1, 1]} : vector<8x128xf32> to vector<8x32xf32>
    %160 = math.tanh %159 : vector<8x32xf32>
    %161 = vector.extract_strided_slice %158 {offsets = [0, 0], sizes = [8, 32], strides = [1, 1]} : vector<8x96xf32> to vector<8x32xf32>
    %162 = vector.extract_strided_slice %158 {offsets = [0, 32], sizes = [8, 32], strides = [1, 1]} : vector<8x96xf32> to vector<8x32xf32>
    %163 = vector.extract_strided_slice %158 {offsets = [0, 64], sizes = [8, 32], strides = [1, 1]} : vector<8x96xf32> to vector<8x32xf32>
    %164 = arith.mulf %162, %139 : vector<8x32xf32>
    %165 = arith.mulf %161, %160 : vector<8x32xf32>
    %166 = arith.addf %164, %165 : vector<8x32xf32>
    %167 = math.tanh %166 : vector<8x32xf32>
    %168 = arith.mulf %163, %167 : vector<8x32xf32>
    %cst_48 = arith.constant dense<0.000000e+00> : vector<8x128xf32>
    %169 = tpu.matmul %168, %8, %cst_48 {dimension_numbers = #tpu.dot_dimension_numbers<[1], [0], [0], [1], [0, 0, 1, 1], [], []>} : vector<8x32xf32>, vector<32x128xf32>, vector<8x128xf32> -> vector<8x128xf32>
    %170 = vector.broadcast %9 : vector<1x128xf32> to vector<8x128xf32>
    %171 = arith.addf %169, %170 : vector<8x128xf32>
    %172 = arith.index_cast %148 : i32 to index
    %c0_49 = arith.constant 0 : index
    %173 = vector.load %arg11[%172, %c0_49] : memref<64x128xf32, #tpu.memory_space<vmem>>, vector<8x128xf32>
    tpu.vector_store %arg11[%172, %c0_49], %171 {strides = array<i32>} : memref<64x128xf32, #tpu.memory_space<vmem>>, vector<8x128xf32>,
    %c6_i32 = arith.constant 6 : i32
    %c8_i32_50 = arith.constant 8 : i32
    %174 = arith.muli %c6_i32, %c8_i32_50 : i32
    %175 = tpu.assume_multiple %174, 8 : i32
    %176 = arith.index_cast %175 : i32 to index
    %c0_51 = arith.constant 0 : index
    %177 = vector.load %arg10[%176, %c0_51] : memref<64x128xf32, #tpu.memory_space<vmem>>, vector<8x128xf32>
    %cst_52 = arith.constant dense<0.000000e+00> : vector<8x128xf32>
    %178 = tpu.matmul %168, %7, %cst_52 {dimension_numbers = #tpu.dot_dimension_numbers<[1], [0], [0], [1], [0, 0, 1, 1], [], []>} : vector<8x32xf32>, vector<32x128xf32>, vector<8x128xf32> -> vector<8x128xf32>
    %179 = arith.addf %177, %178 : vector<8x128xf32>
    %180 = vector.extract_strided_slice %179 {offsets = [0, 0], sizes = [8, 96], strides = [1, 1]} : vector<8x128xf32> to vector<8x96xf32>
    %181 = arith.negf %180 : vector<8x96xf32>
    %182 = math.exp %181 : vector<8x96xf32>
    %cst_53 = arith.constant 1.000000e+00 : f32
    %183 = vector.broadcast %cst_53 : f32 to vector<8x96xf32>
    %184 = arith.addf %183, %182 : vector<8x96xf32>
    %185 = arith.divf %183, %184 : vector<8x96xf32>
    %186 = vector.extract_strided_slice %179 {offsets = [0, 96], sizes = [8, 32], strides = [1, 1]} : vector<8x128xf32> to vector<8x32xf32>
    %187 = math.tanh %186 : vector<8x32xf32>
    %188 = vector.extract_strided_slice %185 {offsets = [0, 0], sizes = [8, 32], strides = [1, 1]} : vector<8x96xf32> to vector<8x32xf32>
    %189 = vector.extract_strided_slice %185 {offsets = [0, 32], sizes = [8, 32], strides = [1, 1]} : vector<8x96xf32> to vector<8x32xf32>
    %190 = vector.extract_strided_slice %185 {offsets = [0, 64], sizes = [8, 32], strides = [1, 1]} : vector<8x96xf32> to vector<8x32xf32>
    %191 = arith.mulf %189, %166 : vector<8x32xf32>
    %192 = arith.mulf %188, %187 : vector<8x32xf32>
    %193 = arith.addf %191, %192 : vector<8x32xf32>
    %194 = math.tanh %193 : vector<8x32xf32>
    %195 = arith.mulf %190, %194 : vector<8x32xf32>
    %cst_54 = arith.constant dense<0.000000e+00> : vector<8x128xf32>
    %196 = tpu.matmul %195, %8, %cst_54 {dimension_numbers = #tpu.dot_dimension_numbers<[1], [0], [0], [1], [0, 0, 1, 1], [], []>} : vector<8x32xf32>, vector<32x128xf32>, vector<8x128xf32> -> vector<8x128xf32>
    %197 = vector.broadcast %9 : vector<1x128xf32> to vector<8x128xf32>
    %198 = arith.addf %196, %197 : vector<8x128xf32>
    %199 = arith.index_cast %175 : i32 to index
    %c0_55 = arith.constant 0 : index
    %200 = vector.load %arg11[%199, %c0_55] : memref<64x128xf32, #tpu.memory_space<vmem>>, vector<8x128xf32>
    tpu.vector_store %arg11[%199, %c0_55], %198 {strides = array<i32>} : memref<64x128xf32, #tpu.memory_space<vmem>>, vector<8x128xf32>,
    %c7_i32 = arith.constant 7 : i32
    %c8_i32_56 = arith.constant 8 : i32
    %201 = arith.muli %c7_i32, %c8_i32_56 : i32
    %202 = tpu.assume_multiple %201, 8 : i32
    %203 = arith.index_cast %202 : i32 to index
    %c0_57 = arith.constant 0 : index
    %204 = vector.load %arg10[%203, %c0_57] : memref<64x128xf32, #tpu.memory_space<vmem>>, vector<8x128xf32>
    %cst_58 = arith.constant dense<0.000000e+00> : vector<8x128xf32>
    %205 = tpu.matmul %195, %7, %cst_58 {dimension_numbers = #tpu.dot_dimension_numbers<[1], [0], [0], [1], [0, 0, 1, 1], [], []>} : vector<8x32xf32>, vector<32x128xf32>, vector<8x128xf32> -> vector<8x128xf32>
    %206 = arith.addf %204, %205 : vector<8x128xf32>
    %207 = vector.extract_strided_slice %206 {offsets = [0, 0], sizes = [8, 96], strides = [1, 1]} : vector<8x128xf32> to vector<8x96xf32>
    %208 = arith.negf %207 : vector<8x96xf32>
    %209 = math.exp %208 : vector<8x96xf32>
    %cst_59 = arith.constant 1.000000e+00 : f32
    %210 = vector.broadcast %cst_59 : f32 to vector<8x96xf32>
    %211 = arith.addf %210, %209 : vector<8x96xf32>
    %212 = arith.divf %210, %211 : vector<8x96xf32>
    %213 = vector.extract_strided_slice %206 {offsets = [0, 96], sizes = [8, 32], strides = [1, 1]} : vector<8x128xf32> to vector<8x32xf32>
    %214 = math.tanh %213 : vector<8x32xf32>
    %215 = vector.extract_strided_slice %212 {offsets = [0, 0], sizes = [8, 32], strides = [1, 1]} : vector<8x96xf32> to vector<8x32xf32>
    %216 = vector.extract_strided_slice %212 {offsets = [0, 32], sizes = [8, 32], strides = [1, 1]} : vector<8x96xf32> to vector<8x32xf32>
    %217 = vector.extract_strided_slice %212 {offsets = [0, 64], sizes = [8, 32], strides = [1, 1]} : vector<8x96xf32> to vector<8x32xf32>
    %218 = arith.mulf %216, %193 : vector<8x32xf32>
    %219 = arith.mulf %215, %214 : vector<8x32xf32>
    %220 = arith.addf %218, %219 : vector<8x32xf32>
    %221 = math.tanh %220 : vector<8x32xf32>
    %222 = arith.mulf %217, %221 : vector<8x32xf32>
    %cst_60 = arith.constant dense<0.000000e+00> : vector<8x128xf32>
    %223 = tpu.matmul %222, %8, %cst_60 {dimension_numbers = #tpu.dot_dimension_numbers<[1], [0], [0], [1], [0, 0, 1, 1], [], []>} : vector<8x32xf32>, vector<32x128xf32>, vector<8x128xf32> -> vector<8x128xf32>
    %224 = vector.broadcast %9 : vector<1x128xf32> to vector<8x128xf32>
    %225 = arith.addf %223, %224 : vector<8x128xf32>
    %226 = arith.index_cast %202 : i32 to index
    %c0_61 = arith.constant 0 : index
    %227 = vector.load %arg11[%226, %c0_61] : memref<64x128xf32, #tpu.memory_space<vmem>>, vector<8x128xf32>
    tpu.vector_store %arg11[%226, %c0_61], %225 {strides = array<i32>} : memref<64x128xf32, #tpu.memory_space<vmem>>, vector<8x128xf32>,
    %c8_i32_62 = arith.constant 8 : i32
    %c0_63 = arith.constant 0 : index
    %c0_64 = arith.constant 0 : index
    %228 = vector.load %arg5[%c0_63, %c0_64] : memref<32x128xf32, #tpu.memory_space<vmem>>, vector<32x128xf32>
    %cst_65 = arith.constant 0.000000e+00 : f32
    %229 = vector.broadcast %cst_65 : f32 to vector<8x32xf32>
    %cst_66 = arith.constant 0.000000e+00 : f32
    %230 = vector.broadcast %cst_66 : f32 to vector<8x32xf32>
    %c0_i32_67 = arith.constant 0 : i32
    %c8_i32_68 = arith.constant 8 : i32
    %231 = arith.muli %c0_i32_67, %c8_i32_68 : i32
    %232 = tpu.assume_multiple %231, 8 : i32
    %233 = arith.index_cast %232 : i32 to index
    %c0_69 = arith.constant 0 : index
    %234 = vector.load %arg11[%233, %c0_69] : memref<64x128xf32, #tpu.memory_space<vmem>>, vector<8x128xf32>
    %cst_70 = arith.constant dense<0.000000e+00> : vector<8x128xf32>
    %235 = tpu.matmul %229, %228, %cst_70 {dimension_numbers = #tpu.dot_dimension_numbers<[1], [0], [0], [1], [0, 0, 1, 1], [], []>} : vector<8x32xf32>, vector<32x128xf32>, vector<8x128xf32> -> vector<8x128xf32>
    %236 = arith.addf %234, %235 : vector<8x128xf32>
    %237 = vector.extract_strided_slice %236 {offsets = [0, 0], sizes = [8, 96], strides = [1, 1]} : vector<8x128xf32> to vector<8x96xf32>
    %238 = arith.negf %237 : vector<8x96xf32>
    %239 = math.exp %238 : vector<8x96xf32>
    %cst_71 = arith.constant 1.000000e+00 : f32
    %240 = vector.broadcast %cst_71 : f32 to vector<8x96xf32>
    %241 = arith.addf %240, %239 : vector<8x96xf32>
    %242 = arith.divf %240, %241 : vector<8x96xf32>
    %243 = vector.extract_strided_slice %236 {offsets = [0, 96], sizes = [8, 32], strides = [1, 1]} : vector<8x128xf32> to vector<8x32xf32>
    %244 = math.tanh %243 : vector<8x32xf32>
    %245 = vector.extract_strided_slice %242 {offsets = [0, 0], sizes = [8, 32], strides = [1, 1]} : vector<8x96xf32> to vector<8x32xf32>
    %246 = vector.extract_strided_slice %242 {offsets = [0, 32], sizes = [8, 32], strides = [1, 1]} : vector<8x96xf32> to vector<8x32xf32>
    %247 = vector.extract_strided_slice %242 {offsets = [0, 64], sizes = [8, 32], strides = [1, 1]} : vector<8x96xf32> to vector<8x32xf32>
    %248 = arith.mulf %246, %230 : vector<8x32xf32>
    %249 = arith.mulf %245, %244 : vector<8x32xf32>
    %250 = arith.addf %248, %249 : vector<8x32xf32>
    %251 = math.tanh %250 : vector<8x32xf32>
    %252 = arith.mulf %247, %251 : vector<8x32xf32>
    %c1_i32_72 = arith.constant 1 : i32
    %c8_i32_73 = arith.constant 8 : i32
    %253 = arith.muli %c1_i32_72, %c8_i32_73 : i32
    %254 = tpu.assume_multiple %253, 8 : i32
    %255 = arith.index_cast %254 : i32 to index
    %c0_74 = arith.constant 0 : index
    %256 = vector.load %arg11[%255, %c0_74] : memref<64x128xf32, #tpu.memory_space<vmem>>, vector<8x128xf32>
    %cst_75 = arith.constant dense<0.000000e+00> : vector<8x128xf32>
    %257 = tpu.matmul %252, %228, %cst_75 {dimension_numbers = #tpu.dot_dimension_numbers<[1], [0], [0], [1], [0, 0, 1, 1], [], []>} : vector<8x32xf32>, vector<32x128xf32>, vector<8x128xf32> -> vector<8x128xf32>
    %258 = arith.addf %256, %257 : vector<8x128xf32>
    %259 = vector.extract_strided_slice %258 {offsets = [0, 0], sizes = [8, 96], strides = [1, 1]} : vector<8x128xf32> to vector<8x96xf32>
    %260 = arith.negf %259 : vector<8x96xf32>
    %261 = math.exp %260 : vector<8x96xf32>
    %cst_76 = arith.constant 1.000000e+00 : f32
    %262 = vector.broadcast %cst_76 : f32 to vector<8x96xf32>
    %263 = arith.addf %262, %261 : vector<8x96xf32>
    %264 = arith.divf %262, %263 : vector<8x96xf32>
    %265 = vector.extract_strided_slice %258 {offsets = [0, 96], sizes = [8, 32], strides = [1, 1]} : vector<8x128xf32> to vector<8x32xf32>
    %266 = math.tanh %265 : vector<8x32xf32>
    %267 = vector.extract_strided_slice %264 {offsets = [0, 0], sizes = [8, 32], strides = [1, 1]} : vector<8x96xf32> to vector<8x32xf32>
    %268 = vector.extract_strided_slice %264 {offsets = [0, 32], sizes = [8, 32], strides = [1, 1]} : vector<8x96xf32> to vector<8x32xf32>
    %269 = vector.extract_strided_slice %264 {offsets = [0, 64], sizes = [8, 32], strides = [1, 1]} : vector<8x96xf32> to vector<8x32xf32>
    %270 = arith.mulf %268, %250 : vector<8x32xf32>
    %271 = arith.mulf %267, %266 : vector<8x32xf32>
    %272 = arith.addf %270, %271 : vector<8x32xf32>
    %273 = math.tanh %272 : vector<8x32xf32>
    %274 = arith.mulf %269, %273 : vector<8x32xf32>
    %c2_i32_77 = arith.constant 2 : i32
    %c8_i32_78 = arith.constant 8 : i32
    %275 = arith.muli %c2_i32_77, %c8_i32_78 : i32
    %276 = tpu.assume_multiple %275, 8 : i32
    %277 = arith.index_cast %276 : i32 to index
    %c0_79 = arith.constant 0 : index
    %278 = vector.load %arg11[%277, %c0_79] : memref<64x128xf32, #tpu.memory_space<vmem>>, vector<8x128xf32>
    %cst_80 = arith.constant dense<0.000000e+00> : vector<8x128xf32>
    %279 = tpu.matmul %274, %228, %cst_80 {dimension_numbers = #tpu.dot_dimension_numbers<[1], [0], [0], [1], [0, 0, 1, 1], [], []>} : vector<8x32xf32>, vector<32x128xf32>, vector<8x128xf32> -> vector<8x128xf32>
    %280 = arith.addf %278, %279 : vector<8x128xf32>
    %281 = vector.extract_strided_slice %280 {offsets = [0, 0], sizes = [8, 96], strides = [1, 1]} : vector<8x128xf32> to vector<8x96xf32>
    %282 = arith.negf %281 : vector<8x96xf32>
    %283 = math.exp %282 : vector<8x96xf32>
    %cst_81 = arith.constant 1.000000e+00 : f32
    %284 = vector.broadcast %cst_81 : f32 to vector<8x96xf32>
    %285 = arith.addf %284, %283 : vector<8x96xf32>
    %286 = arith.divf %284, %285 : vector<8x96xf32>
    %287 = vector.extract_strided_slice %280 {offsets = [0, 96], sizes = [8, 32], strides = [1, 1]} : vector<8x128xf32> to vector<8x32xf32>
    %288 = math.tanh %287 : vector<8x32xf32>
    %289 = vector.extract_strided_slice %286 {offsets = [0, 0], sizes = [8, 32], strides = [1, 1]} : vector<8x96xf32> to vector<8x32xf32>
    %290 = vector.extract_strided_slice %286 {offsets = [0, 32], sizes = [8, 32], strides = [1, 1]} : vector<8x96xf32> to vector<8x32xf32>
    %291 = vector.extract_strided_slice %286 {offsets = [0, 64], sizes = [8, 32], strides = [1, 1]} : vector<8x96xf32> to vector<8x32xf32>
    %292 = arith.mulf %290, %272 : vector<8x32xf32>
    %293 = arith.mulf %289, %288 : vector<8x32xf32>
    %294 = arith.addf %292, %293 : vector<8x32xf32>
    %295 = math.tanh %294 : vector<8x32xf32>
    %296 = arith.mulf %291, %295 : vector<8x32xf32>
    %c3_i32_82 = arith.constant 3 : i32
    %c8_i32_83 = arith.constant 8 : i32
    %297 = arith.muli %c3_i32_82, %c8_i32_83 : i32
    %298 = tpu.assume_multiple %297, 8 : i32
    %299 = arith.index_cast %298 : i32 to index
    %c0_84 = arith.constant 0 : index
    %300 = vector.load %arg11[%299, %c0_84] : memref<64x128xf32, #tpu.memory_space<vmem>>, vector<8x128xf32>
    %cst_85 = arith.constant dense<0.000000e+00> : vector<8x128xf32>
    %301 = tpu.matmul %296, %228, %cst_85 {dimension_numbers = #tpu.dot_dimension_numbers<[1], [0], [0], [1], [0, 0, 1, 1], [], []>} : vector<8x32xf32>, vector<32x128xf32>, vector<8x128xf32> -> vector<8x128xf32>
    %302 = arith.addf %300, %301 : vector<8x128xf32>
    %303 = vector.extract_strided_slice %302 {offsets = [0, 0], sizes = [8, 96], strides = [1, 1]} : vector<8x128xf32> to vector<8x96xf32>
    %304 = arith.negf %303 : vector<8x96xf32>
    %305 = math.exp %304 : vector<8x96xf32>
    %cst_86 = arith.constant 1.000000e+00 : f32
    %306 = vector.broadcast %cst_86 : f32 to vector<8x96xf32>
    %307 = arith.addf %306, %305 : vector<8x96xf32>
    %308 = arith.divf %306, %307 : vector<8x96xf32>
    %309 = vector.extract_strided_slice %302 {offsets = [0, 96], sizes = [8, 32], strides = [1, 1]} : vector<8x128xf32> to vector<8x32xf32>
    %310 = math.tanh %309 : vector<8x32xf32>
    %311 = vector.extract_strided_slice %308 {offsets = [0, 0], sizes = [8, 32], strides = [1, 1]} : vector<8x96xf32> to vector<8x32xf32>
    %312 = vector.extract_strided_slice %308 {offsets = [0, 32], sizes = [8, 32], strides = [1, 1]} : vector<8x96xf32> to vector<8x32xf32>
    %313 = vector.extract_strided_slice %308 {offsets = [0, 64], sizes = [8, 32], strides = [1, 1]} : vector<8x96xf32> to vector<8x32xf32>
    %314 = arith.mulf %312, %294 : vector<8x32xf32>
    %315 = arith.mulf %311, %310 : vector<8x32xf32>
    %316 = arith.addf %314, %315 : vector<8x32xf32>
    %317 = math.tanh %316 : vector<8x32xf32>
    %318 = arith.mulf %313, %317 : vector<8x32xf32>
    %c4_i32_87 = arith.constant 4 : i32
    %c8_i32_88 = arith.constant 8 : i32
    %319 = arith.muli %c4_i32_87, %c8_i32_88 : i32
    %320 = tpu.assume_multiple %319, 8 : i32
    %321 = arith.index_cast %320 : i32 to index
    %c0_89 = arith.constant 0 : index
    %322 = vector.load %arg11[%321, %c0_89] : memref<64x128xf32, #tpu.memory_space<vmem>>, vector<8x128xf32>
    %cst_90 = arith.constant dense<0.000000e+00> : vector<8x128xf32>
    %323 = tpu.matmul %318, %228, %cst_90 {dimension_numbers = #tpu.dot_dimension_numbers<[1], [0], [0], [1], [0, 0, 1, 1], [], []>} : vector<8x32xf32>, vector<32x128xf32>, vector<8x128xf32> -> vector<8x128xf32>
    %324 = arith.addf %322, %323 : vector<8x128xf32>
    %325 = vector.extract_strided_slice %324 {offsets = [0, 0], sizes = [8, 96], strides = [1, 1]} : vector<8x128xf32> to vector<8x96xf32>
    %326 = arith.negf %325 : vector<8x96xf32>
    %327 = math.exp %326 : vector<8x96xf32>
    %cst_91 = arith.constant 1.000000e+00 : f32
    %328 = vector.broadcast %cst_91 : f32 to vector<8x96xf32>
    %329 = arith.addf %328, %327 : vector<8x96xf32>
    %330 = arith.divf %328, %329 : vector<8x96xf32>
    %331 = vector.extract_strided_slice %324 {offsets = [0, 96], sizes = [8, 32], strides = [1, 1]} : vector<8x128xf32> to vector<8x32xf32>
    %332 = math.tanh %331 : vector<8x32xf32>
    %333 = vector.extract_strided_slice %330 {offsets = [0, 0], sizes = [8, 32], strides = [1, 1]} : vector<8x96xf32> to vector<8x32xf32>
    %334 = vector.extract_strided_slice %330 {offsets = [0, 32], sizes = [8, 32], strides = [1, 1]} : vector<8x96xf32> to vector<8x32xf32>
    %335 = vector.extract_strided_slice %330 {offsets = [0, 64], sizes = [8, 32], strides = [1, 1]} : vector<8x96xf32> to vector<8x32xf32>
    %336 = arith.mulf %334, %316 : vector<8x32xf32>
    %337 = arith.mulf %333, %332 : vector<8x32xf32>
    %338 = arith.addf %336, %337 : vector<8x32xf32>
    %339 = math.tanh %338 : vector<8x32xf32>
    %340 = arith.mulf %335, %339 : vector<8x32xf32>
    %c5_i32_92 = arith.constant 5 : i32
    %c8_i32_93 = arith.constant 8 : i32
    %341 = arith.muli %c5_i32_92, %c8_i32_93 : i32
    %342 = tpu.assume_multiple %341, 8 : i32
    %343 = arith.index_cast %342 : i32 to index
    %c0_94 = arith.constant 0 : index
    %344 = vector.load %arg11[%343, %c0_94] : memref<64x128xf32, #tpu.memory_space<vmem>>, vector<8x128xf32>
    %cst_95 = arith.constant dense<0.000000e+00> : vector<8x128xf32>
    %345 = tpu.matmul %340, %228, %cst_95 {dimension_numbers = #tpu.dot_dimension_numbers<[1], [0], [0], [1], [0, 0, 1, 1], [], []>} : vector<8x32xf32>, vector<32x128xf32>, vector<8x128xf32> -> vector<8x128xf32>
    %346 = arith.addf %344, %345 : vector<8x128xf32>
    %347 = vector.extract_strided_slice %346 {offsets = [0, 0], sizes = [8, 96], strides = [1, 1]} : vector<8x128xf32> to vector<8x96xf32>
    %348 = arith.negf %347 : vector<8x96xf32>
    %349 = math.exp %348 : vector<8x96xf32>
    %cst_96 = arith.constant 1.000000e+00 : f32
    %350 = vector.broadcast %cst_96 : f32 to vector<8x96xf32>
    %351 = arith.addf %350, %349 : vector<8x96xf32>
    %352 = arith.divf %350, %351 : vector<8x96xf32>
    %353 = vector.extract_strided_slice %346 {offsets = [0, 96], sizes = [8, 32], strides = [1, 1]} : vector<8x128xf32> to vector<8x32xf32>
    %354 = math.tanh %353 : vector<8x32xf32>
    %355 = vector.extract_strided_slice %352 {offsets = [0, 0], sizes = [8, 32], strides = [1, 1]} : vector<8x96xf32> to vector<8x32xf32>
    %356 = vector.extract_strided_slice %352 {offsets = [0, 32], sizes = [8, 32], strides = [1, 1]} : vector<8x96xf32> to vector<8x32xf32>
    %357 = vector.extract_strided_slice %352 {offsets = [0, 64], sizes = [8, 32], strides = [1, 1]} : vector<8x96xf32> to vector<8x32xf32>
    %358 = arith.mulf %356, %338 : vector<8x32xf32>
    %359 = arith.mulf %355, %354 : vector<8x32xf32>
    %360 = arith.addf %358, %359 : vector<8x32xf32>
    %361 = math.tanh %360 : vector<8x32xf32>
    %362 = arith.mulf %357, %361 : vector<8x32xf32>
    %c6_i32_97 = arith.constant 6 : i32
    %c8_i32_98 = arith.constant 8 : i32
    %363 = arith.muli %c6_i32_97, %c8_i32_98 : i32
    %364 = tpu.assume_multiple %363, 8 : i32
    %365 = arith.index_cast %364 : i32 to index
    %c0_99 = arith.constant 0 : index
    %366 = vector.load %arg11[%365, %c0_99] : memref<64x128xf32, #tpu.memory_space<vmem>>, vector<8x128xf32>
    %cst_100 = arith.constant dense<0.000000e+00> : vector<8x128xf32>
    %367 = tpu.matmul %362, %228, %cst_100 {dimension_numbers = #tpu.dot_dimension_numbers<[1], [0], [0], [1], [0, 0, 1, 1], [], []>} : vector<8x32xf32>, vector<32x128xf32>, vector<8x128xf32> -> vector<8x128xf32>
    %368 = arith.addf %366, %367 : vector<8x128xf32>
    %369 = vector.extract_strided_slice %368 {offsets = [0, 0], sizes = [8, 96], strides = [1, 1]} : vector<8x128xf32> to vector<8x96xf32>
    %370 = arith.negf %369 : vector<8x96xf32>
    %371 = math.exp %370 : vector<8x96xf32>
    %cst_101 = arith.constant 1.000000e+00 : f32
    %372 = vector.broadcast %cst_101 : f32 to vector<8x96xf32>
    %373 = arith.addf %372, %371 : vector<8x96xf32>
    %374 = arith.divf %372, %373 : vector<8x96xf32>
    %375 = vector.extract_strided_slice %368 {offsets = [0, 96], sizes = [8, 32], strides = [1, 1]} : vector<8x128xf32> to vector<8x32xf32>
    %376 = math.tanh %375 : vector<8x32xf32>
    %377 = vector.extract_strided_slice %374 {offsets = [0, 0], sizes = [8, 32], strides = [1, 1]} : vector<8x96xf32> to vector<8x32xf32>
    %378 = vector.extract_strided_slice %374 {offsets = [0, 32], sizes = [8, 32], strides = [1, 1]} : vector<8x96xf32> to vector<8x32xf32>
    %379 = vector.extract_strided_slice %374 {offsets = [0, 64], sizes = [8, 32], strides = [1, 1]} : vector<8x96xf32> to vector<8x32xf32>
    %380 = arith.mulf %378, %360 : vector<8x32xf32>
    %381 = arith.mulf %377, %376 : vector<8x32xf32>
    %382 = arith.addf %380, %381 : vector<8x32xf32>
    %383 = math.tanh %382 : vector<8x32xf32>
    %384 = arith.mulf %379, %383 : vector<8x32xf32>
    %c7_i32_102 = arith.constant 7 : i32
    %c8_i32_103 = arith.constant 8 : i32
    %385 = arith.muli %c7_i32_102, %c8_i32_103 : i32
    %386 = tpu.assume_multiple %385, 8 : i32
    %387 = arith.index_cast %386 : i32 to index
    %c0_104 = arith.constant 0 : index
    %388 = vector.load %arg11[%387, %c0_104] : memref<64x128xf32, #tpu.memory_space<vmem>>, vector<8x128xf32>
    %cst_105 = arith.constant dense<0.000000e+00> : vector<8x128xf32>
    %389 = tpu.matmul %384, %228, %cst_105 {dimension_numbers = #tpu.dot_dimension_numbers<[1], [0], [0], [1], [0, 0, 1, 1], [], []>} : vector<8x32xf32>, vector<32x128xf32>, vector<8x128xf32> -> vector<8x128xf32>
    %390 = arith.addf %388, %389 : vector<8x128xf32>
    %391 = vector.extract_strided_slice %390 {offsets = [0, 0], sizes = [8, 96], strides = [1, 1]} : vector<8x128xf32> to vector<8x96xf32>
    %392 = arith.negf %391 : vector<8x96xf32>
    %393 = math.exp %392 : vector<8x96xf32>
    %cst_106 = arith.constant 1.000000e+00 : f32
    %394 = vector.broadcast %cst_106 : f32 to vector<8x96xf32>
    %395 = arith.addf %394, %393 : vector<8x96xf32>
    %396 = arith.divf %394, %395 : vector<8x96xf32>
    %397 = vector.extract_strided_slice %390 {offsets = [0, 96], sizes = [8, 32], strides = [1, 1]} : vector<8x128xf32> to vector<8x32xf32>
    %398 = math.tanh %397 : vector<8x32xf32>
    %399 = vector.extract_strided_slice %396 {offsets = [0, 0], sizes = [8, 32], strides = [1, 1]} : vector<8x96xf32> to vector<8x32xf32>
    %400 = vector.extract_strided_slice %396 {offsets = [0, 32], sizes = [8, 32], strides = [1, 1]} : vector<8x96xf32> to vector<8x32xf32>
    %401 = vector.extract_strided_slice %396 {offsets = [0, 64], sizes = [8, 32], strides = [1, 1]} : vector<8x96xf32> to vector<8x32xf32>
    %402 = arith.mulf %400, %382 : vector<8x32xf32>
    %403 = arith.mulf %399, %398 : vector<8x32xf32>
    %404 = arith.addf %402, %403 : vector<8x32xf32>
    %405 = math.tanh %404 : vector<8x32xf32>
    %406 = arith.mulf %401, %405 : vector<8x32xf32>
    %c8_i32_107 = arith.constant 8 : i32
    %c0_108 = arith.constant 0 : index
    %c0_109 = arith.constant 0 : index
    %407 = vector.load %arg7[%c0_108, %c0_109] : memref<32x128xf32, #tpu.memory_space<vmem>>, vector<32x128xf32>
    %cst_110 = arith.constant dense<0.000000e+00> : vector<8x128xf32>
    %408 = tpu.matmul %406, %407, %cst_110 {dimension_numbers = #tpu.dot_dimension_numbers<[1], [0], [0], [1], [0, 0, 1, 1], [], []>} : vector<8x32xf32>, vector<32x128xf32>, vector<8x128xf32> -> vector<8x128xf32>
    %c0_111 = arith.constant 0 : index
    %c0_112 = arith.constant 0 : index
    %409 = vector.load %arg8[%c0_111, %c0_112] : memref<1x128xf32, #tpu.memory_space<vmem>>, vector<1x128xf32>
    %410 = vector.broadcast %409 : vector<1x128xf32> to vector<8x128xf32>
    %411 = arith.addf %408, %410 : vector<8x128xf32>
    %cst_113 = arith.constant dense<0xFF800000> : vector<8xf32>
    %412 = vector.multi_reduction <maximumf>, %411, %cst_113 [1] : vector<8x128xf32> to vector<8xf32>
    %413 = vector.shape_cast %412 : vector<8xf32> to vector<8x1xf32>
    %414 = vector.broadcast %413 : vector<8x1xf32> to vector<8x128xf32>
    %415 = arith.subf %411, %414 : vector<8x128xf32>
    %416 = math.exp %415 : vector<8x128xf32>
    %cst_114 = arith.constant dense<0.000000e+00> : vector<8xf32>
    %417 = vector.multi_reduction <add>, %416, %cst_114 [1] : vector<8x128xf32> to vector<8xf32>
    %418 = vector.shape_cast %417 : vector<8xf32> to vector<8x1xf32>
    %419 = vector.broadcast %418 : vector<8x1xf32> to vector<8x128xf32>
    %420 = arith.divf %416, %419 : vector<8x128xf32>
    %c0_115 = arith.constant 0 : index
    %c0_116 = arith.constant 0 : index
    %421 = vector.load %arg9[%c0_115, %c0_116] : memref<8x128xf32, #tpu.memory_space<vmem>>, vector<8x128xf32>
    tpu.vector_store %arg9[%c0_115, %c0_116], %420 {strides = array<i32>} : memref<8x128xf32, #tpu.memory_space<vmem>>, vector<8x128xf32>,
    return
  }
}

</mosaic_0001>

<bundles_post_ra>
// kernel: lstm_model_forward.1
= control target key start
LH: loop header
LB: loop body
LE: loop exit
PB: predicated region body
PF: predicated region fallthrough
CT: control target
= control target key end

     0   :  { %v3115_v0 = vmov 0.0   ;;  %vm3116_vm0 = vmmov 0   ;;  %vm49_vm1 = vcmask 130048   ;;  %s3117_s25 = smov 32   ;;  %vm197_vm2 = vcmask 261120   ;;  %s3696_s1 = inlined_call_operand.vmem [shape: f32[16,128], index: 1, kind: input, shape index: {}]   ;;  %s3697_s2 = inlined_call_operand.vmem [shape: f32[32,128], index: 2, kind: input, shape index: {}]   ;;  %s3698_s0 = inlined_call_operand.vmem [shape: f32[64,16], index: 0, kind: input, shape index: {}]   ;;  %s3699_s3 = inlined_call_operand.vmem [shape: f32[1,128], index: 3, kind: input, shape index: {}]   ;;  %s3700_s4 = inlined_call_operand.vmem [shape: f32[32,128], index: 4, kind: input, shape index: {}]   ;;  %s3701_s5 = inlined_call_operand.vmem [shape: f32[32,128], index: 5, kind: input, shape index: {}]   ;;  %s3702_s6 = inlined_call_operand.vmem [shape: f32[1,128], index: 6, kind: input, shape index: {}]   ;;  %s3703_s7 = inlined_call_operand.vmem [shape: f32[32,128], index: 7, kind: input, shape index: {}]   ;;  %s3704_s8 = inlined_call_operand.vmem [shape: f32[1,128], index: 8, kind: input, shape index: {}]   ;;  %s3705_s9 = inlined_call_operand.vmem [shape: f32[8,128], index: 9, kind: output, shape index: {}]  }
   0x1   :  { %2704 = vmatprep.subr.mxu1 %v3115_v0  ;;  %v41_v1 = vld [vmem:[%s3696_s1 + $0x8] sm:$0xff]  ;;  %v3176_v2 = vld [vmem:[%s3697_s2 + $0x18] sm:$0xff]  ;;  %v40_v3 = vld [vmem:[%s3696_s1] sm:$0xff]  ;;  %2712 = vmatprep.mubr.msk.f32.mxu1 %vm3116_vm0, %v3115_v0 }
   0x2   :  { %2688 = vmatprep.subr.mxu0 %v41_v1  ;;  %2705 = vmatpush3.msra.mxu1 %v3176_v2  ;;  %v3187_v4 = vld [vmem:[%s3697_s2 + $0x10] sm:$0xff]  ;;  %v32_v5 = vld [vmem:[%s3698_s0] sm:$0xff]  ;;  %v33_v6 = vld [vmem:[%s3698_s0 + $0x8] sm:$0xff] }
   0x3   :  { %2689 = vmatpush3.msra.mxu0 %v41_v1  ;;  %2706 = vmatprep.subr.mxu1 %v3115_v0  ;;  %v3200_v7 = vld [vmem:[%s3697_s2 + $0x8] sm:$0xff]  ;;  %v3208_v8 = vld [vmem:[%s3697_s2] sm:$0xff]  ;;  %v34_v26 = vld [vmem:[%s3698_s0 + $0x10] sm:$0xff] }
   0x4   :  { %2690 = vmatprep.subr.mxu0 %v40_v3  ;;  %2707 = vmatpush3.msra.mxu1 %v3187_v4  ;;  %v3231_v10 = vld [vmem:[%s3699_s3] ss:$0 sm:$0xff]  ;;  %v35_v27 = vld [vmem:[%s3698_s0 + $0x18] sm:$0xff]  ;;  %v3259_v30 = vld [vmem:[%s3700_s4 + $0x10] sm:$0xff] }
   0x5   :  { %2691 = vmatpush3.msra.mxu0 %v40_v3  ;;  %2692 = vmatprep.mubr.msk.f32.mxu0 %vm49_vm1, %v32_v5  ;;  %v36_v28 = vld [vmem:[%s3698_s0 + $0x20] sm:$0xff]  ;;  %v3252_v29 = vld [vmem:[%s3700_s4 + $0x18] sm:$0xff]  ;;  %v37_v31 = vld [vmem:[%s3698_s0 + $0x28] sm:$0xff] }
   0x6   :  { %2708 = vmatprep.subr.mxu1 %v3115_v0  ;;  %2693 = vmatmul.mubr.msk.f32.vlgmr.msra.gmra.mxu0 %vm49_vm1, %v33_v6  ;;  %v3269_v32 = vld [vmem:[%s3700_s4 + $0x8] sm:$0xff]  ;;  %v38_v33 = vld [vmem:[%s3698_s0 + $0x30] sm:$0xff]  ;;  %v3279_v34 = vld [vmem:[%s3700_s4] sm:$0xff]  ;;  %s3118_s4 = smov 64  }
   0x7   :  { %2709 = vmatpush3.msra.mxu1 %v3200_v7  ;;  %2726 = vmatprep.subr.mxu0 %v3115_v0  ;;  %v39_v35 = vld [vmem:[%s3698_s0 + $0x38] sm:$0xff] }
   0x8   :  { %2710 = vmatprep.subr.mxu1 %v3115_v0  ;;  %2727 = vmatpush3.msra.mxu0 %v3176_v2 }
   0x9   :  { %2711 = vmatpush3.msra.mxu1 %v3208_v8  ;;  %2728 = vmatprep.subr.mxu0 %v3115_v0 }
   0xa   :  { %2713 = vmatmul.mubr.f32.vlgmr.msra.gmra.mxu1 %v3115_v0  ;;  %2729 = vmatpush3.msra.mxu0 %v3187_v4 }
   0xb   :  { %2730 = vmatprep.subr.mxu0 %v3115_v0  ;;  %2715 = vmatprep.subr.mxu1 %v3115_v0 }
   0xc   :  { %2731 = vmatpush3.msra.mxu0 %v3200_v7  ;;  %2723 = vmatprep.mubr.msk.f32.mxu1 %vm3116_vm0, %v3115_v0 }
   0xd   :  { %2732 = vmatprep.subr.mxu0 %v3115_v0  ;;  %2695 = vmatprep.mubr.msk.f32.mxu0 %vm49_vm1, %v34_v26 }
   0xe   :  { %2733 = vmatpush3.msra.mxu0 %v3208_v8  ;;  %2716 = vmatpush3.msra.mxu1 %v3252_v29 }
   0xf   :  { %2748 = vmatprep.subr.mxu0 %v3115_v0  ;;  %2696 = vmatmul.mubr.msk.f32.gmra.mxu0 %vm49_vm1, %v35_v27 }
  0x10   :  { %2698 = vmatprep.mubr.msk.f32.mxu0 %vm49_vm1, %v36_v28  ;;  %2717 = vmatprep.subr.mxu1 %v3115_v0 }
  0x11   :  { %2718 = vmatpush3.msra.mxu1 %v3259_v30 }
  0x12   :  { %2719 = vmatprep.subr.mxu1 %v3115_v0 }
  0x13   :  { %2699 = vmatmul.mubr.msk.f32.gmra.mxu0 %vm49_vm1, %v37_v31  ;;  %2720 = vmatpush3.msra.mxu1 %v3269_v32 }
  0x14   :  { %2701 = vmatprep.mubr.msk.f32.mxu0 %vm49_vm1, %v38_v33  ;;  %2721 = vmatprep.subr.mxu1 %v3115_v0 }
  0x15   :  { %2722 = vmatpush3.msra.mxu1 %v3279_v34 }
  0x16   :  { %2737 = vmatprep.subr.mxu1 %v3115_v0 }
  0x17   :  { %2702 = vmatmul.mubr.msk.f32.gmra.mxu0 %vm49_vm1, %v39_v35 }
  0x18   :  { %2734 = vmatprep.mubr.msk.f32.mxu0 %vm3116_vm0, %v3115_v0 }
  0xc6   :  { %v3226_v9 = vpop.f32.mrf.mxu0 }
  0xc7   :  { %v146_v46 = vadd.f32 %v3226_v9, %v3231_v10 }
  0xc8   :  { %v140_v11 = vpop.f32.mrf.mxu0 }
  0xc9   :  { %v141_v12 = vadd.f32 %v3231_v10, %v140_v11 }
  0xca   :  { %v267_v13 = vpop.f32.mrf.mxu1 }
  0xcb   :  { %v271_v14 = vadd.f32 %v267_v13, %v141_v12 }
  0xcc   :  { %v2714_v15 = vpop.f32.mrf.mxu1 }
  0xcd   :  { %2983 = vtanh.f32 %v271_v14  ;;  %v2512_v17 = vmul.f32 -1.442695, %v271_v14 }
  0xcf   :  { %2985 = vpow2.f32 %v2512_v17  ;;  %v3317_v40 = vpop.f32.mrf.mxu0 }
  0xd0   :  { %v156_v28 = vadd.f32 %v3317_v40, %v3231_v10 }
  0xd1   :  { %v150_v41 = vpop.f32.mrf.mxu0 }
  0xd2   :  { %v151_v5 = vadd.f32 %v3231_v10, %v150_v41 }
  0xd3   :  { %v3319_v42 = vpop.f32.mrf.mxu0 }
  0xd5   :  { %v3321_v43 = vpop.f32.mrf.mxu0 }
  0xd7   :  { %v3323_v44 = vpop.f32.mrf.mxu0 }
  0xd9   :  { %v3325_v45 = vpop.f32.mrf.mxu0 }
  0xda   :  { %v2984_v16 = vpop.eup %2983 }
  0xdb   :  { %281 = vrot.lane.b32.xlu0 %v2984_v16, %s3117_s25 }
  0xdc   :  { %v2986_v18 = vpop.eup %2985 }
  0xdd   :  { %v275_v19 = vadd.f32 1.0, %v2986_v18 }
  0xdf   :  { %2987 = vrcp.f32 %v275_v19 }
  0xec   :  { %v2988_v20 = vpop.eup %2987 }
  0xed   :  { %v279_v23 = vmul.f32 0.0, %v2988_v20 }
 0x14d   :  { %v282_v21 = vpop.permute.xlu0 %281 }
 0x14e   :  { %v284_v22 = vmul.f32 %v2988_v20, %v282_v21 }
 0x150   :  { %286 = vrot.lane.b32.xlu0 %v284_v22, %s3117_s25 }
 0x1c2   :  { %v287_v24 = vpop.permute.xlu0 %286 }
 0x1c3   :  { %v3236_v25 = vadd.f32 %v287_v24, %v279_v23 }
 0x1c5   :  { %2989 = vtanh.f32 %v3236_v25 }
 0x1d2   :  { %v2990_v36 = vpop.eup %2989 }
 0x1d3   :  { %292 = vrot.lane.b32.xlu1 %v2990_v36, %s3117_s25 }
 0x245   :  { %v293_v37 = vpop.permute.xlu1 %292 }
 0x246   :  { %v295_v38 = vmul.f32 %v2988_v20, %v293_v37 }
 0x248   :  { %303 = vrot.lane.b32.xlu1 %v295_v38, %s3118_s4 }
 0x2ba   :  { %v304_v39 = vpop.permute.xlu1 %303 }
 0x2bb   :  { %2724 = vmatmul.mubr.msk.f32.vlgmr.msra.gmra.mxu1 %vm197_vm2, %v304_v39  ;;  %2735 = vmatmul.mubr.msk.f32.vlgmr.msra.gmra.mxu0 %vm197_vm2, %v304_v39 }
 0x2bc   :  { %2738 = vmatpush3.msra.mxu1 %v3252_v29  ;;  %2749 = vmatpush3.msra.mxu0 %v3176_v2 }
 0x2bd   :  { %2739 = vmatprep.subr.mxu1 %v3115_v0  ;;  %2750 = vmatprep.subr.mxu0 %v3115_v0 }
 0x2be   :  { %2740 = vmatpush3.msra.mxu1 %v3259_v30  ;;  %2751 = vmatpush3.msra.mxu0 %v3187_v4 }
 0x2bf   :  { %2741 = vmatprep.subr.mxu1 %v3115_v0  ;;  %2752 = vmatprep.subr.mxu0 %v3115_v0 }
 0x2c0   :  { %2742 = vmatpush3.msra.mxu1 %v3269_v32  ;;  %2753 = vmatpush3.msra.mxu0 %v3200_v7 }
 0x2c1   :  { %2743 = vmatprep.subr.mxu1 %v3115_v0  ;;  %2754 = vmatprep.subr.mxu0 %v3115_v0 }
 0x2c2   :  { %2755 = vmatpush3.msra.mxu0 %v3208_v8  ;;  %2756 = vmatprep.mubr.msk.f32.mxu0 %vm3116_vm0, %v3115_v0 }
 0x2c3   :  { %2744 = vmatpush3.msra.mxu1 %v3279_v34  ;;  %2745 = vmatprep.mubr.msk.f32.mxu1 %vm3116_vm0, %v3115_v0 }
 0x2c4   :  { %2759 = vmatprep.subr.mxu1 %v3115_v0  ;;  %2770 = vmatprep.subr.mxu0 %v3115_v0 }
 0x37b   :  { %v3329_v47 = vpop.f32.mrf.mxu1  ;;  %v446_v48 = vpop.f32.mrf.mxu0 }
 0x37c   :  { %v450_v49 = vadd.f32 %v446_v48, %v146_v46 }
 0x37d   :  { %v2725_v50 = vpop.f32.mrf.mxu1  ;;  %v2736_v51 = vpop.f32.mrf.mxu0 }
 0x37e   :  { %2991 = vtanh.f32 %v450_v49  ;;  %v2516_v53 = vmul.f32 -1.442695, %v450_v49 }
 0x380   :  { %2993 = vpow2.f32 %v2516_v53 }
 0x38b   :  { %v2992_v52 = vpop.eup %2991 }
 0x38c   :  { %460 = vrot.lane.b32.xlu0 %v2992_v52, %s3117_s25 }
 0x38d   :  { %v2994_v54 = vpop.eup %2993 }
 0x38e   :  { %v454_v55 = vadd.f32 1.0, %v2994_v54 }
 0x390   :  { %2995 = vrcp.f32 %v454_v55 }
 0x39d   :  { %v2996_v56 = vpop.eup %2995 }
 0x39e   :  { %v458_v59 = vmul.f32 %v2996_v56, %v3236_v25 }
 0x3fe   :  { %v461_v57 = vpop.permute.xlu0 %460 }
 0x3ff   :  { %v463_v58 = vmul.f32 %v2996_v56, %v461_v57  ;;  %v161_v57 = vadd.f32 %v3231_v10, %v3321_v43 }
 0x401   :  { %465 = vrot.lane.b32.xlu1 %v463_v58, %s3117_s25 }
 0x473   :  { %v466_v60 = vpop.permute.xlu1 %465 }
 0x474   :  { %v468_v61 = vadd.f32 %v466_v60, %v458_v59 }
 0x476   :  { %2997 = vtanh.f32 %v468_v61 }
 0x483   :  { %v2998_v62 = vpop.eup %2997 }
 0x484   :  { %471 = vrot.lane.b32.xlu0 %v2998_v62, %s3117_s25 }
 0x4f6   :  { %v472_v63 = vpop.permute.xlu0 %471 }
 0x4f7   :  { %v474_v1 = vmul.f32 %v2996_v56, %v472_v63 }
 0x4f9   :  { %476 = vrot.lane.b32.xlu1 %v474_v1, %s3118_s4 }
 0x56b   :  { %v477_v3 = vpop.permute.xlu1 %476 }
 0x56c   :  { %2746 = vmatmul.mubr.msk.f32.vlgmr.msra.gmra.mxu1 %vm197_vm2, %v477_v3  ;;  %2757 = vmatmul.mubr.msk.f32.vlgmr.msra.gmra.mxu0 %vm197_vm2, %v477_v3 }
 0x56d   :  { %2760 = vmatpush3.msra.mxu1 %v3252_v29  ;;  %2771 = vmatpush3.msra.mxu0 %v3176_v2 }
 0x56e   :  { %2761 = vmatprep.subr.mxu1 %v3115_v0  ;;  %2772 = vmatprep.subr.mxu0 %v3115_v0 }
 0x56f   :  { %2762 = vmatpush3.msra.mxu1 %v3259_v30  ;;  %2773 = vmatpush3.msra.mxu0 %v3187_v4 }
 0x570   :  { %2763 = vmatprep.subr.mxu1 %v3115_v0  ;;  %2774 = vmatprep.subr.mxu0 %v3115_v0 }
 0x571   :  { %2764 = vmatpush3.msra.mxu1 %v3269_v32  ;;  %2775 = vmatpush3.msra.mxu0 %v3200_v7 }
 0x572   :  { %2765 = vmatprep.subr.mxu1 %v3115_v0  ;;  %2776 = vmatprep.subr.mxu0 %v3115_v0 }
 0x573   :  { %2777 = vmatpush3.msra.mxu0 %v3208_v8  ;;  %2778 = vmatprep.mubr.msk.f32.mxu0 %vm3116_vm0, %v3115_v0 }
 0x574   :  { %2766 = vmatpush3.msra.mxu1 %v3279_v34  ;;  %2767 = vmatprep.mubr.msk.f32.mxu1 %vm3116_vm0, %v3115_v0 }
 0x575   :  { %2781 = vmatprep.subr.mxu1 %v3115_v0  ;;  %2792 = vmatprep.subr.mxu0 %v3115_v0 }
 0x62c   :  { %v3359_v6 = vpop.f32.mrf.mxu1  ;;  %v620_v9 = vpop.f32.mrf.mxu0 }
 0x62d   :  { %v624_v11 = vadd.f32 %v620_v9, %v151_v5 }
 0x62e   :  { %v2747_v12 = vpop.f32.mrf.mxu1  ;;  %v2758_v13 = vpop.f32.mrf.mxu0 }
 0x62f   :  { %2999 = vtanh.f32 %v624_v11  ;;  %v2519_v15 = vmul.f32 -1.442695, %v624_v11 }
 0x631   :  { %3001 = vpow2.f32 %v2519_v15 }
 0x63c   :  { %v3000_v14 = vpop.eup %2999 }
 0x63d   :  { %634 = vrot.lane.b32.xlu0 %v3000_v14, %s3117_s25 }
 0x63e   :  { %v3002_v16 = vpop.eup %3001 }
 0x63f   :  { %v628_v17 = vadd.f32 1.0, %v3002_v16 }
 0x641   :  { %3003 = vrcp.f32 %v628_v17 }
 0x64e   :  { %v3004_v18 = vpop.eup %3003 }
 0x64f   :  { %v632_v21 = vmul.f32 %v3004_v18, %v468_v61 }
 0x6af   :  { %v635_v19 = vpop.permute.xlu0 %634 }
 0x6b0   :  { %v637_v20 = vmul.f32 %v3004_v18, %v635_v19  ;;  %v166_v19 = vadd.f32 %v3319_v42, %v3231_v10 }
 0x6b2   :  { %639 = vrot.lane.b32.xlu1 %v637_v20, %s3117_s25 }
 0x724   :  { %v640_v22 = vpop.permute.xlu1 %639 }
 0x725   :  { %v642_v23 = vadd.f32 %v640_v22, %v632_v21 }
 0x727   :  { %3005 = vtanh.f32 %v642_v23 }
 0x734   :  { %v3006_v24 = vpop.eup %3005 }
 0x735   :  { %645 = vrot.lane.b32.xlu0 %v3006_v24, %s3117_s25 }
 0x7a7   :  { %v646_v25 = vpop.permute.xlu0 %645 }
 0x7a8   :  { %v648_v26 = vmul.f32 %v3004_v18, %v646_v25 }
 0x7aa   :  { %650 = vrot.lane.b32.xlu1 %v648_v26, %s3118_s4 }
 0x81c   :  { %v651_v27 = vpop.permute.xlu1 %650 }
 0x81d   :  { %2768 = vmatmul.mubr.msk.f32.vlgmr.msra.gmra.mxu1 %vm197_vm2, %v651_v27  ;;  %2779 = vmatmul.mubr.msk.f32.vlgmr.msra.gmra.mxu0 %vm197_vm2, %v651_v27 }
 0x81e   :  { %2782 = vmatpush3.msra.mxu1 %v3252_v29  ;;  %2793 = vmatpush3.msra.mxu0 %v3176_v2 }
 0x81f   :  { %2783 = vmatprep.subr.mxu1 %v3115_v0  ;;  %2794 = vmatprep.subr.mxu0 %v3115_v0 }
 0x820   :  { %2784 = vmatpush3.msra.mxu1 %v3259_v30  ;;  %2795 = vmatpush3.msra.mxu0 %v3187_v4 }
 0x821   :  { %2785 = vmatprep.subr.mxu1 %v3115_v0  ;;  %2796 = vmatprep.subr.mxu0 %v3115_v0 }
 0x822   :  { %2786 = vmatpush3.msra.mxu1 %v3269_v32  ;;  %2797 = vmatpush3.msra.mxu0 %v3200_v7 }
 0x823   :  { %2787 = vmatprep.subr.mxu1 %v3115_v0  ;;  %2798 = vmatprep.subr.mxu0 %v3115_v0 }
 0x824   :  { %2799 = vmatpush3.msra.mxu0 %v3208_v8  ;;  %2800 = vmatprep.mubr.msk.f32.mxu0 %vm3116_vm0, %v3115_v0 }
 0x825   :  { %2788 = vmatpush3.msra.mxu1 %v3279_v34  ;;  %2789 = vmatprep.mubr.msk.f32.mxu1 %vm3116_vm0, %v3115_v0 }
 0x826   :  { %2803 = vmatprep.subr.mxu1 %v3115_v0  ;;  %2814 = vmatprep.subr.mxu0 %v3115_v0 }
 0x8dd   :  { %v3389_v31 = vpop.f32.mrf.mxu1  ;;  %v794_v33 = vpop.f32.mrf.mxu0 }
 0x8de   :  { %v798_v35 = vadd.f32 %v794_v33, %v156_v28 }
 0x8df   :  { %v2769_v36 = vpop.f32.mrf.mxu1  ;;  %v2780_v37 = vpop.f32.mrf.mxu0 }
 0x8e0   :  { %3007 = vtanh.f32 %v798_v35  ;;  %v2522_v39 = vmul.f32 -1.442695, %v798_v35 }
 0x8e2   :  { %3009 = vpow2.f32 %v2522_v39 }
 0x8ed   :  { %v3008_v38 = vpop.eup %3007 }
 0x8ee   :  { %808 = vrot.lane.b32.xlu0 %v3008_v38, %s3117_s25 }
 0x8ef   :  { %v3010_v41 = vpop.eup %3009 }
 0x8f0   :  { %v802_v46 = vadd.f32 1.0, %v3010_v41 }
 0x8f2   :  { %3011 = vrcp.f32 %v802_v46 }
 0x8ff   :  { %v3012_v48 = vpop.eup %3011 }
 0x900   :  { %v806_v40 = vmul.f32 %v3012_v48, %v642_v23 }
 0x960   :  { %v809_v49 = vpop.permute.xlu0 %808 }
 0x961   :  { %v811_v50 = vmul.f32 %v3012_v48, %v809_v49 }
 0x963   :  { %813 = vrot.lane.b32.xlu1 %v811_v50, %s3117_s25 }
 0x9d5   :  { %v814_v51 = vpop.permute.xlu1 %813 }
 0x9d6   :  { %v816_v52 = vadd.f32 %v814_v51, %v806_v40 }
 0x9d8   :  { %3013 = vtanh.f32 %v816_v52 }
 0x9e5   :  { %v3014_v53 = vpop.eup %3013 }
 0x9e6   :  { %819 = vrot.lane.b32.xlu0 %v3014_v53, %s3117_s25 }
 0xa58   :  { %v820_v54 = vpop.permute.xlu0 %819 }
 0xa59   :  { %v822_v55 = vmul.f32 %v3012_v48, %v820_v54 }
 0xa5b   :  { %824 = vrot.lane.b32.xlu1 %v822_v55, %s3118_s4 }
 0xacd   :  { %v825_v56 = vpop.permute.xlu1 %824 }
 0xace   :  { %2790 = vmatmul.mubr.msk.f32.vlgmr.msra.gmra.mxu1 %vm197_vm2, %v825_v56  ;;  %2801 = vmatmul.mubr.msk.f32.vlgmr.msra.gmra.mxu0 %vm197_vm2, %v825_v56 }
 0xacf   :  { %2804 = vmatpush3.msra.mxu1 %v3252_v29  ;;  %2815 = vmatpush3.msra.mxu0 %v3176_v2 }
 0xad0   :  { %2805 = vmatprep.subr.mxu1 %v3115_v0  ;;  %2816 = vmatprep.subr.mxu0 %v3115_v0 }
 0xad1   :  { %2806 = vmatpush3.msra.mxu1 %v3259_v30  ;;  %2817 = vmatpush3.msra.mxu0 %v3187_v4 }
 0xad2   :  { %2807 = vmatprep.subr.mxu1 %v3115_v0  ;;  %2818 = vmatprep.subr.mxu0 %v3115_v0 }
 0xad3   :  { %2808 = vmatpush3.msra.mxu1 %v3269_v32  ;;  %2819 = vmatpush3.msra.mxu0 %v3200_v7 }
 0xad4   :  { %2809 = vmatprep.subr.mxu1 %v3115_v0  ;;  %2820 = vmatprep.subr.mxu0 %v3115_v0 }
 0xad5   :  { %2821 = vmatpush3.msra.mxu0 %v3208_v8  ;;  %2822 = vmatprep.mubr.msk.f32.mxu0 %vm3116_vm0, %v3115_v0 }
 0xad6   :  { %2810 = vmatpush3.msra.mxu1 %v3279_v34  ;;  %2811 = vmatprep.mubr.msk.f32.mxu1 %vm3116_vm0, %v3115_v0 }
 0xad7   :  { %2825 = vmatprep.subr.mxu1 %v3115_v0  ;;  %2836 = vmatprep.subr.mxu0 %v3115_v0 }
 0xb8e   :  { %v3419_v58 = vpop.f32.mrf.mxu1  ;;  %v968_v59 = vpop.f32.mrf.mxu0 }
 0xb8f   :  { %v972_v60 = vadd.f32 %v968_v59, %v161_v57 }
 0xb90   :  { %v2791_v61 = vpop.f32.mrf.mxu1  ;;  %v2802_v62 = vpop.f32.mrf.mxu0 }
 0xb91   :  { %3015 = vtanh.f32 %v972_v60  ;;  %v2525_v1 = vmul.f32 -1.442695, %v972_v60 }
 0xb93   :  { %3017 = vpow2.f32 %v2525_v1 }
 0xb9e   :  { %v3016_v63 = vpop.eup %3015 }
 0xb9f   :  { %982 = vrot.lane.b32.xlu0 %v3016_v63, %s3117_s25  ;;  %v3491_v63 = vld [vmem:[%s3701_s5 + $0x18] sm:$0xff] }
 0xba0   :  { %v3018_v3 = vpop.eup %3017 }
 0xba1   :  { %v976_v5 = vadd.f32 1.0, %v3018_v3  ;;  %v3498_v3 = vld [vmem:[%s3701_s5 + $0x10] sm:$0xff] }
 0xba3   :  { %3019 = vrcp.f32 %v976_v5  ;;  %v3507_v5 = vld [vmem:[%s3701_s5 + $0x8] sm:$0xff] }
 0xbb0   :  { %v3020_v9 = vpop.eup %3019 }
 0xbb1   :  { %v980_v43 = vmul.f32 %v3020_v9, %v816_v52 }
 0xc11   :  { %v983_v11 = vpop.permute.xlu0 %982 }
 0xc12   :  { %v985_v12 = vmul.f32 %v3020_v9, %v983_v11 }
 0xc14   :  { %987 = vrot.lane.b32.xlu1 %v985_v12, %s3117_s25 }
 0xc86   :  { %v988_v13 = vpop.permute.xlu1 %987 }
 0xc87   :  { %v990_v14 = vadd.f32 %v988_v13, %v980_v43  ;;  %v3548_v43 = vld [vmem:[%s3702_s6] ss:$0 sm:$0xff] }
 0xc88   :  { %v374_v13 = vadd.f32 %v3548_v43, %v3329_v47 }
 0xc89   :  { %3021 = vtanh.f32 %v990_v14 }
 0xc96   :  { %v3022_v15 = vpop.eup %3021 }
 0xc97   :  { %993 = vrot.lane.b32.xlu0 %v3022_v15, %s3117_s25 }
 0xd09   :  { %v994_v16 = vpop.permute.xlu0 %993 }
 0xd0a   :  { %v996_v17 = vmul.f32 %v3020_v9, %v994_v16  ;;  %v3516_v9 = vld [vmem:[%s3701_s5] sm:$0xff] }
 0xd0c   :  { %998 = vrot.lane.b32.xlu1 %v996_v17, %s3118_s4 }
 0xd7e   :  { %v999_v18 = vpop.permute.xlu1 %998 }
 0xd7f   :  { %2812 = vmatmul.mubr.msk.f32.vlgmr.msra.gmra.mxu1 %vm197_vm2, %v999_v18  ;;  %2823 = vmatmul.mubr.msk.f32.vlgmr.msra.gmra.mxu0 %vm197_vm2, %v999_v18 }
 0xd80   :  { %2826 = vmatpush3.msra.mxu1 %v3252_v29  ;;  %2837 = vmatpush3.msra.mxu0 %v3176_v2 }
 0xd81   :  { %2827 = vmatprep.subr.mxu1 %v3115_v0  ;;  %2838 = vmatprep.subr.mxu0 %v3115_v0 }
 0xd82   :  { %2828 = vmatpush3.msra.mxu1 %v3259_v30  ;;  %2839 = vmatpush3.msra.mxu0 %v3187_v4 }
 0xd83   :  { %2829 = vmatprep.subr.mxu1 %v3115_v0  ;;  %2840 = vmatprep.subr.mxu0 %v3115_v0 }
 0xd84   :  { %2830 = vmatpush3.msra.mxu1 %v3269_v32  ;;  %2841 = vmatpush3.msra.mxu0 %v3200_v7 }
 0xd85   :  { %2831 = vmatprep.subr.mxu1 %v3115_v0  ;;  %2842 = vmatprep.subr.mxu0 %v3115_v0 }
 0xd86   :  { %2843 = vmatpush3.msra.mxu0 %v3208_v8  ;;  %2844 = vmatprep.mubr.msk.f32.mxu0 %vm3116_vm0, %v3115_v0 }
 0xd87   :  { %2832 = vmatpush3.msra.mxu1 %v3279_v34  ;;  %2833 = vmatprep.mubr.msk.f32.mxu1 %vm3116_vm0, %v3115_v0 }
 0xd88   :  { %2858 = vmatprep.subr.mxu0 %v3115_v0  ;;  %2847 = vmatprep.subr.mxu1 %v3115_v0 }
 0xe3f   :  { %v3449_v20 = vpop.f32.mrf.mxu1  ;;  %v1142_v21 = vpop.f32.mrf.mxu0 }
 0xe40   :  { %v1146_v22 = vadd.f32 %v1142_v21, %v166_v19 }
 0xe41   :  { %v2813_v23 = vpop.f32.mrf.mxu1  ;;  %v2824_v24 = vpop.f32.mrf.mxu0 }
 0xe42   :  { %3023 = vtanh.f32 %v1146_v22  ;;  %v2528_v26 = vmul.f32 -1.442695, %v1146_v22 }
 0xe44   :  { %3025 = vpow2.f32 %v2528_v26 }
 0xe4f   :  { %v3024_v25 = vpop.eup %3023 }
 0xe50   :  { %1156 = vrot.lane.b32.xlu0 %v3024_v25, %s3117_s25 }
 0xe51   :  { %v3026_v27 = vpop.eup %3025 }
 0xe52   :  { %v1150_v28 = vadd.f32 1.0, %v3026_v27 }
 0xe54   :  { %3027 = vrcp.f32 %v1150_v28 }
 0xe61   :  { %v3028_v33 = vpop.eup %3027 }
 0xe62   :  { %v1154_v42 = vmul.f32 %v3028_v33, %v990_v14 }
 0xec2   :  { %v1157_v35 = vpop.permute.xlu0 %1156 }
 0xec3   :  { %v1159_v36 = vmul.f32 %v3028_v33, %v1157_v35 }
 0xec5   :  { %1161 = vrot.lane.b32.xlu1 %v1159_v36, %s3117_s25 }
 0xf37   :  { %v1162_v37 = vpop.permute.xlu1 %1161 }
 0xf38   :  { %v1164_v38 = vadd.f32 %v1162_v37, %v1154_v42 }
 0xf3a   :  { %3029 = vtanh.f32 %v1164_v38 }
 0xf47   :  { %v3030_v39 = vpop.eup %3029 }
 0xf48   :  { %1167 = vrot.lane.b32.xlu0 %v3030_v39, %s3117_s25 }
 0xfba   :  { %v1168_v41 = vpop.permute.xlu0 %1167 }
 0xfbb   :  { %v1170_v46 = vmul.f32 %v3028_v33, %v1168_v41 }
 0xfbd   :  { %1172 = vrot.lane.b32.xlu1 %v1170_v46, %s3118_s4 }
0x102f   :  { %v1173_v48 = vpop.permute.xlu1 %1172 }
0x1030   :  { %2834 = vmatmul.mubr.msk.f32.vlgmr.msra.gmra.mxu1 %vm197_vm2, %v1173_v48  ;;  %2845 = vmatmul.mubr.msk.f32.vlgmr.msra.gmra.mxu0 %vm197_vm2, %v1173_v48 }
0x1031   :  { %2859 = vmatpush3.msra.mxu0 %v3176_v2  ;;  %2848 = vmatpush3.msra.mxu1 %v3252_v29  ;;  %v171_v2 = vadd.f32 %v3231_v10, %v3325_v45 }
0x1032   :  { %2860 = vmatprep.subr.mxu0 %v3115_v0  ;;  %2849 = vmatprep.subr.mxu1 %v3115_v0 }
0x1033   :  { %2861 = vmatpush3.msra.mxu0 %v3187_v4  ;;  %2850 = vmatpush3.msra.mxu1 %v3259_v30 }
0x1034   :  { %2862 = vmatprep.subr.mxu0 %v3115_v0  ;;  %2851 = vmatprep.subr.mxu1 %v3115_v0 }
0x1035   :  { %2863 = vmatpush3.msra.mxu0 %v3200_v7  ;;  %2852 = vmatpush3.msra.mxu1 %v3269_v32 }
0x1036   :  { %2864 = vmatprep.subr.mxu0 %v3115_v0  ;;  %2853 = vmatprep.subr.mxu1 %v3115_v0 }
0x1037   :  { %2865 = vmatpush3.msra.mxu0 %v3208_v8  ;;  %2866 = vmatprep.mubr.msk.f32.mxu0 %vm3116_vm0, %v3115_v0 }
0x1038   :  { %2880 = vmatprep.subr.mxu0 %v3115_v0  ;;  %2854 = vmatpush3.msra.mxu1 %v3279_v34 }
0x1039   :  { %2855 = vmatprep.mubr.msk.f32.mxu1 %vm3116_vm0, %v3115_v0  ;;  %2869 = vmatprep.subr.mxu1 %v3115_v0 }
0x10f0   :  { %v3479_v4 = vpop.f32.mrf.mxu1  ;;  %v1316_v7 = vpop.f32.mrf.mxu0 }
0x10f1   :  { %v1320_v49 = vadd.f32 %v1316_v7, %v171_v2 }
0x10f2   :  { %v2835_v8 = vpop.f32.mrf.mxu1  ;;  %v2846_v50 = vpop.f32.mrf.mxu0 }
0x10f3   :  { %3031 = vtanh.f32 %v1320_v49  ;;  %v2531_v51 = vmul.f32 -1.442695, %v1320_v49 }
0x10f5   :  { %3033 = vpow2.f32 %v2531_v51  ;;  %v547_v51 = vadd.f32 %v3548_v43, %v3359_v6 }
0x1100   :  { %v3032_v40 = vpop.eup %3031 }
0x1101   :  { %1330 = vrot.lane.b32.xlu0 %v3032_v40, %s3117_s25 }
0x1102   :  { %v3034_v52 = vpop.eup %3033 }
0x1103   :  { %v1324_v53 = vadd.f32 1.0, %v3034_v52 }
0x1105   :  { %3035 = vrcp.f32 %v1324_v53 }
0x1112   :  { %v3036_v54 = vpop.eup %3035 }
0x1113   :  { %v1328_v45 = vmul.f32 %v3036_v54, %v1164_v38 }
0x1173   :  { %v1331_v55 = vpop.permute.xlu0 %1330 }
0x1174   :  { %v1333_v56 = vmul.f32 %v3036_v54, %v1331_v55 }
0x1176   :  { %1335 = vrot.lane.b32.xlu1 %v1333_v56, %s3117_s25 }
0x11e8   :  { %v1336_v57 = vpop.permute.xlu1 %1335 }
0x11e9   :  { %v3483_v59 = vadd.f32 %v1336_v57, %v1328_v45 }
0x11eb   :  { %3037 = vtanh.f32 %v3483_v59 }
0x11f8   :  { %v3038_v60 = vpop.eup %3037 }
0x11f9   :  { %1341 = vrot.lane.b32.xlu0 %v3038_v60, %s3117_s25 }
0x126b   :  { %v1342_v61 = vpop.permute.xlu0 %1341 }
0x126c   :  { %v1344_v62 = vmul.f32 %v3036_v54, %v1342_v61 }
0x126e   :  { %1346 = vrot.lane.b32.xlu1 %v1344_v62, %s3118_s4 }
0x12e0   :  { %v1347_v1 = vpop.permute.xlu1 %1346 }
0x12e1   :  { %2856 = vmatmul.mubr.msk.f32.vlgmr.msra.gmra.mxu1 %vm197_vm2, %v1347_v1  ;;  %2867 = vmatmul.mubr.msk.f32.vlgmr.msra.gmra.mxu0 %vm197_vm2, %v1347_v1 }
0x12e2   :  { %2881 = vmatpush3.msra.mxu0 %v3491_v63  ;;  %2888 = vmatprep.mubr.msk.f32.mxu0 %vm3116_vm0, %v3115_v0 }
0x12e3   :  { %2882 = vmatprep.subr.mxu0 %v3115_v0  ;;  %2870 = vmatpush3.msra.mxu1 %v3252_v29  ;;  %v176_v29 = vadd.f32 %v3323_v44, %v3231_v10 }
0x12e4   :  { %2883 = vmatpush3.msra.mxu0 %v3498_v3  ;;  %2871 = vmatprep.subr.mxu1 %v3115_v0 }
0x12e5   :  { %2884 = vmatprep.subr.mxu0 %v3115_v0  ;;  %2872 = vmatpush3.msra.mxu1 %v3259_v30 }
0x12e6   :  { %2885 = vmatpush3.msra.mxu0 %v3507_v5  ;;  %2873 = vmatprep.subr.mxu1 %v3115_v0 }
0x12e7   :  { %2886 = vmatprep.subr.mxu0 %v3115_v0  ;;  %2874 = vmatpush3.msra.mxu1 %v3269_v32 }
0x12e8   :  { %2887 = vmatpush3.msra.mxu0 %v3516_v9  ;;  %2875 = vmatprep.subr.mxu1 %v3115_v0 }
0x12e9   :  { %2889 = vmatmul.mubr.f32.vlgmr.msra.gmra.mxu0 %v3115_v0  ;;  %2876 = vmatpush3.msra.mxu1 %v3279_v34 }
0x12ea   :  { %2877 = vmatprep.mubr.msk.f32.mxu1 %vm3116_vm0, %v3115_v0  ;;  %2891 = vmatprep.subr.mxu1 %v3115_v0 }
0x12eb   :  { %2902 = vmatprep.subr.mxu0 %v3115_v0  ;;  %2910 = vmatprep.mubr.msk.f32.mxu0 %vm3116_vm0, %v3115_v0 }
0x12ec   :  { %2903 = vmatpush3.msra.mxu0 %v3491_v63 }
0x12ed   :  { %2904 = vmatprep.subr.mxu0 %v3115_v0 }
0x12ee   :  { %2905 = vmatpush3.msra.mxu0 %v3498_v3 }
0x12ef   :  { %2906 = vmatprep.subr.mxu0 %v3115_v0 }
0x12f0   :  { %2907 = vmatpush3.msra.mxu0 %v3507_v5 }
0x12f1   :  { %2908 = vmatprep.subr.mxu0 %v3115_v0 }
0x12f2   :  { %2909 = vmatpush3.msra.mxu0 %v3516_v9 }
0x12f3   :  { %2924 = vmatprep.subr.mxu0 %v3115_v0 }
0x13a1   :  { %v3543_v30 = vpop.f32.mrf.mxu1  ;;  %v1490_v32 = vpop.f32.mrf.mxu0 }
0x13a2   :  { %v1494_v34 = vadd.f32 %v1490_v32, %v176_v29 }
0x13a3   :  { %v2857_v11 = vpop.f32.mrf.mxu1  ;;  %v2868_v12 = vpop.f32.mrf.mxu0 }
0x13a4   :  { %3039 = vtanh.f32 %v1494_v34  ;;  %v2534_v17 = vmul.f32 -1.442695, %v1494_v34  ;;  %v721_v12 = vadd.f32 %v3548_v43, %v3389_v31 }
0x13a9   :  { %v1667_v14 = vpop.f32.mrf.mxu0 }
0x13aa   :  { %v1671_v15 = vadd.f32 %v1667_v14, %v374_v13 }
0x13ab   :  { %v2890_v16 = vpop.f32.mrf.mxu0 }
0x13ac   :  { %3041 = vtanh.f32 %v1671_v15  ;;  %v2536_v18 = vmul.f32 -1.442695, %v1671_v15 }
0x13ad   :  { %3043 = vpow2.f32 %v2534_v17 }
0x13ae   :  { %3045 = vpow2.f32 %v2536_v18 }
0x13b1   :  { %v3040_v10 = vpop.eup %3039 }
0x13b2   :  { %1504 = vrot.lane.b32.xlu0 %v3040_v10, %s3117_s25 }
0x13b9   :  { %v3042_v44 = vpop.eup %3041 }
0x13ba   :  { %1681 = vrot.lane.b32.xlu1 %v3042_v44, %s3117_s25  ;;  %v3044_v19 = vpop.eup %3043 }
0x13bb   :  { %v1498_v21 = vadd.f32 1.0, %v3044_v19  ;;  %v3046_v22 = vpop.eup %3045 }
0x13bc   :  { %v1675_v23 = vadd.f32 1.0, %v3046_v22 }
0x13bd   :  { %3047 = vrcp.f32 %v1498_v21 }
0x13be   :  { %3049 = vrcp.f32 %v1675_v23 }
0x13ca   :  { %v3048_v47 = vpop.eup %3047 }
0x13cb   :  { %v3050_v26 = vpop.eup %3049  ;;  %v1502_v33 = vmul.f32 %v3048_v47, %v3483_v59 }
0x13cc   :  { %v1679_v42 = vmul.f32 0.0, %v3050_v26 }
0x1424   :  { %v1505_v24 = vpop.permute.xlu0 %1504 }
0x1425   :  { %v1507_v25 = vmul.f32 %v3048_v47, %v1505_v24 }
0x1427   :  { %1509 = vrot.lane.b32.xlu0 %v1507_v25, %s3117_s25 }
0x142c   :  { %v1682_v27 = vpop.permute.xlu1 %1681 }
0x142d   :  { %v1684_v28 = vmul.f32 %v3050_v26, %v1682_v27  ;;  %v895_v27 = vadd.f32 %v3548_v43, %v3419_v58 }
0x142f   :  { %1686 = vrot.lane.b32.xlu1 %v1684_v28, %s3117_s25 }
0x1499   :  { %v1510_v35 = vpop.permute.xlu0 %1509 }
0x149a   :  { %v1512_v36 = vadd.f32 %v1510_v35, %v1502_v33 }
0x149c   :  { %3051 = vtanh.f32 %v1512_v36 }
0x14a1   :  { %v1687_v37 = vpop.permute.xlu1 %1686 }
0x14a2   :  { %v1689_v38 = vadd.f32 %v1687_v37, %v1679_v42 }
0x14a4   :  { %3053 = vtanh.f32 %v1689_v38 }
0x14a9   :  { %v3052_v39 = vpop.eup %3051 }
0x14aa   :  { %1515 = vrot.lane.b32.xlu0 %v3052_v39, %s3117_s25 }
0x14b1   :  { %v3054_v41 = vpop.eup %3053 }
0x14b2   :  { %1692 = vrot.lane.b32.xlu1 %v3054_v41, %s3117_s25 }
0x151c   :  { %v1516_v46 = vpop.permute.xlu0 %1515 }
0x151d   :  { %v1518_v48 = vmul.f32 %v3048_v47, %v1516_v46 }
0x151f   :  { %1520 = vrot.lane.b32.xlu0 %v1518_v48, %s3118_s4 }
0x1524   :  { %v1693_v2 = vpop.permute.xlu1 %1692 }
0x1525   :  { %v1695_v7 = vmul.f32 %v3050_v26, %v1693_v2 }
0x1527   :  { %1698 = vrot.lane.b32.xlu1 %v1695_v7, %s3118_s4 }
0x1591   :  { %v1521_v49 = vpop.permute.xlu0 %1520 }
0x1592   :  { %2878 = vmatmul.mubr.msk.f32.vlgmr.msra.gmra.mxu1 %vm197_vm2, %v1521_v49 }
0x1593   :  { %2892 = vmatpush3.msra.mxu1 %v3491_v63  ;;  %2899 = vmatprep.mubr.msk.f32.mxu1 %vm3116_vm0, %v3115_v0 }
0x1594   :  { %2893 = vmatprep.subr.mxu1 %v3115_v0 }
0x1595   :  { %2894 = vmatpush3.msra.mxu1 %v3498_v3 }
0x1596   :  { %2895 = vmatprep.subr.mxu1 %v3115_v0 }
0x1597   :  { %2896 = vmatpush3.msra.mxu1 %v3507_v5 }
0x1598   :  { %2897 = vmatprep.subr.mxu1 %v3115_v0 }
0x1599   :  { %2898 = vmatpush3.msra.mxu1 %v3516_v9  ;;  %v1699_v8 = vpop.permute.xlu1 %1698 }
0x159a   :  { %2900 = vmatmul.mubr.msk.f32.vlgmr.msra.gmra.mxu1 %vm197_vm2, %v1699_v8  ;;  %2913 = vmatprep.subr.mxu1 %v3115_v0 }
0x159b   :  { %2914 = vmatpush3.msra.mxu1 %v3491_v63  ;;  %2921 = vmatprep.mubr.msk.f32.mxu1 %vm3116_vm0, %v3115_v0 }
0x159c   :  { %2915 = vmatprep.subr.mxu1 %v3115_v0 }
0x159d   :  { %2916 = vmatpush3.msra.mxu1 %v3498_v3 }
0x159e   :  { %2917 = vmatprep.subr.mxu1 %v3115_v0 }
0x159f   :  { %2918 = vmatpush3.msra.mxu1 %v3507_v5 }
0x15a0   :  { %2919 = vmatprep.subr.mxu1 %v3115_v0 }
0x15a1   :  { %2920 = vmatpush3.msra.mxu1 %v3516_v9 }
0x15a2   :  { %2935 = vmatprep.subr.mxu1 %v3115_v0 }
0x1652   :  { %v3583_v50 = vpop.f32.mrf.mxu1 }
0x1654   :  { %v2879_v40 = vpop.f32.mrf.mxu1 }
0x165a   :  { %v1768_v52 = vpop.f32.mrf.mxu1 }
0x165b   :  { %v1772_v53 = vadd.f32 %v1768_v52, %v547_v51  ;;  %v1069_v51 = vadd.f32 %v3548_v43, %v3449_v20 }
0x165c   :  { %v2901_v54 = vpop.f32.mrf.mxu1 }
0x165d   :  { %3055 = vtanh.f32 %v1772_v53  ;;  %v2538_v56 = vmul.f32 -1.442695, %v1772_v53 }
0x165f   :  { %3057 = vpow2.f32 %v2538_v56 }
0x166a   :  { %v3056_v55 = vpop.eup %3055 }
0x166b   :  { %1782 = vrot.lane.b32.xlu0 %v3056_v55, %s3117_s25 }
0x166c   :  { %v3058_v45 = vpop.eup %3057 }
0x166d   :  { %v1776_v57 = vadd.f32 1.0, %v3058_v45 }
0x166f   :  { %3059 = vrcp.f32 %v1776_v57 }
0x167c   :  { %v3060_v59 = vpop.eup %3059 }
0x167d   :  { %v1780_v62 = vmul.f32 %v3060_v59, %v1689_v38 }
0x16dd   :  { %v1783_v60 = vpop.permute.xlu0 %1782 }
0x16de   :  { %v1785_v61 = vmul.f32 %v3060_v59, %v1783_v60 }
0x16e0   :  { %1787 = vrot.lane.b32.xlu1 %v1785_v61, %s3117_s25 }
0x1752   :  { %v1788_v1 = vpop.permute.xlu1 %1787 }
0x1753   :  { %v1790_v6 = vadd.f32 %v1788_v1, %v1780_v62 }
0x1755   :  { %3061 = vtanh.f32 %v1790_v6 }
0x1762   :  { %v3062_v29 = vpop.eup %3061 }
0x1763   :  { %1793 = vrot.lane.b32.xlu0 %v3062_v29, %s3117_s25 }
0x17d5   :  { %v1794_v32 = vpop.permute.xlu0 %1793 }
0x17d6   :  { %v1796_v34 = vmul.f32 %v3060_v59, %v1794_v32 }
0x17d8   :  { %1799 = vrot.lane.b32.xlu1 %v1796_v34, %s3118_s4 }
0x184a   :  { %v1800_v11 = vpop.permute.xlu1 %1799 }
0x184b   :  { %2911 = vmatmul.mubr.msk.f32.vlgmr.msra.gmra.mxu0 %vm197_vm2, %v1800_v11  ;;  %v1243_v11 = vadd.f32 %v3548_v43, %v3479_v4 }
0x184c   :  { %2925 = vmatpush3.msra.mxu0 %v3491_v63  ;;  %2932 = vmatprep.mubr.msk.f32.mxu0 %vm3116_vm0, %v3115_v0 }
0x184d   :  { %2926 = vmatprep.subr.mxu0 %v3115_v0 }
0x184e   :  { %2927 = vmatpush3.msra.mxu0 %v3498_v3 }
0x184f   :  { %2928 = vmatprep.subr.mxu0 %v3115_v0 }
0x1850   :  { %2929 = vmatpush3.msra.mxu0 %v3507_v5 }
0x1851   :  { %2930 = vmatprep.subr.mxu0 %v3115_v0 }
0x1852   :  { %2931 = vmatpush3.msra.mxu0 %v3516_v9 }
0x1853   :  { %2946 = vmatprep.subr.mxu0 %v3115_v0 }
0x190b   :  { %v1869_v13 = vpop.f32.mrf.mxu0 }
0x190c   :  { %v1873_v14 = vadd.f32 %v1869_v13, %v721_v12 }
0x190d   :  { %v2912_v15 = vpop.f32.mrf.mxu0 }
0x190e   :  { %3063 = vtanh.f32 %v1873_v14  ;;  %v2540_v10 = vmul.f32 -1.442695, %v1873_v14 }
0x1910   :  { %3065 = vpow2.f32 %v2540_v10 }
0x191b   :  { %v3064_v16 = vpop.eup %3063 }
0x191c   :  { %1883 = vrot.lane.b32.xlu0 %v3064_v16, %s3117_s25 }
0x191d   :  { %v3066_v44 = vpop.eup %3065 }
0x191e   :  { %v1877_v17 = vadd.f32 1.0, %v3066_v44 }
0x1920   :  { %3067 = vrcp.f32 %v1877_v17 }
0x192d   :  { %v3068_v18 = vpop.eup %3067 }
0x192e   :  { %v1881_v22 = vmul.f32 %v3068_v18, %v1790_v6 }
0x198e   :  { %v1884_v19 = vpop.permute.xlu0 %1883 }
0x198f   :  { %v1886_v21 = vmul.f32 %v3068_v18, %v1884_v19 }
0x1991   :  { %1888 = vrot.lane.b32.xlu1 %v1886_v21, %s3117_s25 }
0x1a03   :  { %v1889_v23 = vpop.permute.xlu1 %1888 }
0x1a04   :  { %v1891_v31 = vadd.f32 %v1889_v23, %v1881_v22  ;;  %v1417_v23 = vadd.f32 %v3548_v43, %v3543_v30 }
0x1a06   :  { %3069 = vtanh.f32 %v1891_v31 }
0x1a13   :  { %v3070_v47 = vpop.eup %3069 }
0x1a14   :  { %1894 = vrot.lane.b32.xlu0 %v3070_v47, %s3117_s25 }
0x1a86   :  { %v1895_v24 = vpop.permute.xlu0 %1894 }
0x1a87   :  { %v1897_v25 = vmul.f32 %v3068_v18, %v1895_v24 }
0x1a89   :  { %1900 = vrot.lane.b32.xlu1 %v1897_v25, %s3118_s4 }
0x1afb   :  { %v1901_v26 = vpop.permute.xlu1 %1900 }
0x1afc   :  { %2922 = vmatmul.mubr.msk.f32.vlgmr.msra.gmra.mxu1 %vm197_vm2, %v1901_v26 }
0x1afd   :  { %2936 = vmatpush3.msra.mxu1 %v3491_v63  ;;  %2943 = vmatprep.mubr.msk.f32.mxu1 %vm3116_vm0, %v3115_v0 }
0x1afe   :  { %2937 = vmatprep.subr.mxu1 %v3115_v0 }
0x1aff   :  { %2938 = vmatpush3.msra.mxu1 %v3498_v3 }
0x1b00   :  { %2939 = vmatprep.subr.mxu1 %v3115_v0 }
0x1b01   :  { %2940 = vmatpush3.msra.mxu1 %v3507_v5 }
0x1b02   :  { %2941 = vmatprep.subr.mxu1 %v3115_v0 }
0x1b03   :  { %2942 = vmatpush3.msra.mxu1 %v3516_v9 }
0x1b04   :  { %2957 = vmatprep.subr.mxu1 %v3115_v0 }
0x1bbc   :  { %v1970_v28 = vpop.f32.mrf.mxu1 }
0x1bbd   :  { %v1974_v33 = vadd.f32 %v1970_v28, %v895_v27 }
0x1bbe   :  { %v2923_v35 = vpop.f32.mrf.mxu1 }
0x1bbf   :  { %3071 = vtanh.f32 %v1974_v33  ;;  %v2542_v42 = vmul.f32 -1.442695, %v1974_v33 }
0x1bc1   :  { %3073 = vpow2.f32 %v2542_v42 }
0x1bcc   :  { %v3072_v36 = vpop.eup %3071 }
0x1bcd   :  { %1984 = vrot.lane.b32.xlu0 %v3072_v36, %s3117_s25 }
0x1bce   :  { %v3074_v37 = vpop.eup %3073 }
0x1bcf   :  { %v1978_v38 = vadd.f32 1.0, %v3074_v37 }
0x1bd1   :  { %3075 = vrcp.f32 %v1978_v38 }
0x1bde   :  { %v3076_v39 = vpop.eup %3075 }
0x1bdf   :  { %v1982_v48 = vmul.f32 %v3076_v39, %v1891_v31 }
0x1c3f   :  { %v1985_v41 = vpop.permute.xlu0 %1984 }
0x1c40   :  { %v1987_v46 = vmul.f32 %v3076_v39, %v1985_v41 }
0x1c42   :  { %1989 = vrot.lane.b32.xlu1 %v1987_v46, %s3117_s25 }
0x1cb4   :  { %v1990_v2 = vpop.permute.xlu1 %1989 }
0x1cb5   :  { %v1992_v58 = vadd.f32 %v1990_v2, %v1982_v48  ;;  %v1591_v48 = vadd.f32 %v3548_v43, %v3583_v50  ;;  %v2406_v50 = vld [vmem:[%s3703_s7 + $0x18] sm:$0xff] }
0x1cb7   :  { %3077 = vtanh.f32 %v1992_v58 }
0x1cc4   :  { %v3078_v7 = vpop.eup %3077 }
0x1cc5   :  { %1995 = vrot.lane.b32.xlu0 %v3078_v7, %s3117_s25 }
0x1d37   :  { %v1996_v49 = vpop.permute.xlu0 %1995 }
0x1d38   :  { %v1998_v8 = vmul.f32 %v3076_v39, %v1996_v49 }
0x1d3a   :  { %2001 = vrot.lane.b32.xlu1 %v1998_v8, %s3118_s4 }
0x1dac   :  { %v2002_v40 = vpop.permute.xlu1 %2001 }
0x1dad   :  { %2933 = vmatmul.mubr.msk.f32.vlgmr.msra.gmra.mxu0 %vm197_vm2, %v2002_v40 }
0x1dae   :  { %2947 = vmatpush3.msra.mxu0 %v3491_v63  ;;  %2954 = vmatprep.mubr.msk.f32.mxu0 %vm3116_vm0, %v3115_v0 }
0x1daf   :  { %2948 = vmatprep.subr.mxu0 %v3115_v0 }
0x1db0   :  { %2949 = vmatpush3.msra.mxu0 %v3498_v3 }
0x1db1   :  { %2950 = vmatprep.subr.mxu0 %v3115_v0 }
0x1db2   :  { %2951 = vmatpush3.msra.mxu0 %v3507_v5 }
0x1db3   :  { %2952 = vmatprep.subr.mxu0 %v3115_v0 }
0x1db4   :  { %2953 = vmatpush3.msra.mxu0 %v3516_v9 }
0x1db5   :  { %2968 = vmatprep.subr.mxu0 %v3115_v0 }
0x1e6d   :  { %v2071_v52 = vpop.f32.mrf.mxu0 }
0x1e6e   :  { %v2075_v53 = vadd.f32 %v2071_v52, %v1069_v51 }
0x1e6f   :  { %v2934_v54 = vpop.f32.mrf.mxu0 }
0x1e70   :  { %3079 = vtanh.f32 %v2075_v53  ;;  %v2544_v56 = vmul.f32 -1.442695, %v2075_v53 }
0x1e72   :  { %3081 = vpow2.f32 %v2544_v56 }
0x1e7d   :  { %v3080_v55 = vpop.eup %3079 }
0x1e7e   :  { %2085 = vrot.lane.b32.xlu0 %v3080_v55, %s3117_s25 }
0x1e7f   :  { %v3082_v45 = vpop.eup %3081 }
0x1e80   :  { %v2079_v57 = vadd.f32 1.0, %v3082_v45  ;;  %v2405_v45 = vld [vmem:[%s3703_s7 + $0x10] sm:$0xff] }
0x1e82   :  { %3083 = vrcp.f32 %v2079_v57  ;;  %v2404_v57 = vld [vmem:[%s3703_s7 + $0x8] sm:$0xff] }
0x1e8f   :  { %v3084_v59 = vpop.eup %3083 }
0x1e90   :  { %v2083_v62 = vmul.f32 %v3084_v59, %v1992_v58 }
0x1ef0   :  { %v2086_v60 = vpop.permute.xlu0 %2085 }
0x1ef1   :  { %v2088_v61 = vmul.f32 %v3084_v59, %v2086_v60 }
0x1ef3   :  { %2090 = vrot.lane.b32.xlu1 %v2088_v61, %s3117_s25 }
0x1f65   :  { %v2091_v1 = vpop.permute.xlu1 %2090 }
0x1f66   :  { %v2093_v20 = vadd.f32 %v2091_v1, %v2083_v62 }
0x1f68   :  { %3085 = vtanh.f32 %v2093_v20 }
0x1f75   :  { %v3086_v6 = vpop.eup %3085 }
0x1f76   :  { %2096 = vrot.lane.b32.xlu0 %v3086_v6, %s3117_s25 }
0x1fe8   :  { %v2097_v29 = vpop.permute.xlu0 %2096 }
0x1fe9   :  { %v2099_v32 = vmul.f32 %v3084_v59, %v2097_v29  ;;  %v2403_v59 = vld [vmem:[%s3703_s7] sm:$0xff] }
0x1feb   :  { %2102 = vrot.lane.b32.xlu1 %v2099_v32, %s3118_s4 }
0x205d   :  { %v2103_v34 = vpop.permute.xlu1 %2102 }
0x205e   :  { %2944 = vmatmul.mubr.msk.f32.vlgmr.msra.gmra.mxu1 %vm197_vm2, %v2103_v34 }
0x205f   :  { %2958 = vmatpush3.msra.mxu1 %v3491_v63  ;;  %2965 = vmatprep.mubr.msk.f32.mxu1 %vm3116_vm0, %v3115_v0 }
0x2060   :  { %2959 = vmatprep.subr.mxu1 %v3115_v0 }
0x2061   :  { %2960 = vmatpush3.msra.mxu1 %v3498_v3 }
0x2062   :  { %2961 = vmatprep.subr.mxu1 %v3115_v0 }
0x2063   :  { %2962 = vmatpush3.msra.mxu1 %v3507_v5 }
0x2064   :  { %2963 = vmatprep.subr.mxu1 %v3115_v0 }
0x2065   :  { %2964 = vmatpush3.msra.mxu1 %v3516_v9 }
0x211e   :  { %v2172_v12 = vpop.f32.mrf.mxu1 }
0x211f   :  { %v2176_v63 = vadd.f32 %v2172_v12, %v1243_v11 }
0x2120   :  { %v2945_v13 = vpop.f32.mrf.mxu1 }
0x2121   :  { %3087 = vtanh.f32 %v2176_v63  ;;  %v2546_v15 = vmul.f32 -1.442695, %v2176_v63 }
0x2123   :  { %3089 = vpow2.f32 %v2546_v15 }
0x212e   :  { %v3088_v14 = vpop.eup %3087 }
0x212f   :  { %2186 = vrot.lane.b32.xlu0 %v3088_v14, %s3117_s25 }
0x2130   :  { %v3090_v3 = vpop.eup %3089 }
0x2131   :  { %v2180_v16 = vadd.f32 1.0, %v3090_v3 }
0x2133   :  { %3091 = vrcp.f32 %v2180_v16 }
0x2140   :  { %v3092_v5 = vpop.eup %3091 }
0x2141   :  { %v2184_v9 = vmul.f32 %v3092_v5, %v2093_v20  ;;  %v2551_v20 = vld [vmem:[%s3704_s8] ss:$0 sm:$0xff] }
0x21a1   :  { %v2187_v10 = vpop.permute.xlu0 %2186 }
0x21a2   :  { %v2189_v44 = vmul.f32 %v3092_v5, %v2187_v10 }
0x21a4   :  { %2191 = vrot.lane.b32.xlu1 %v2189_v44, %s3117_s25 }
0x2216   :  { %v2192_v17 = vpop.permute.xlu1 %2191 }
0x2217   :  { %v2194_v4 = vadd.f32 %v2192_v17, %v2184_v9 }
0x2219   :  { %3093 = vtanh.f32 %v2194_v4 }
0x2226   :  { %v3094_v18 = vpop.eup %3093 }
0x2227   :  { %2197 = vrot.lane.b32.xlu0 %v3094_v18, %s3117_s25 }
0x2299   :  { %v2198_v19 = vpop.permute.xlu0 %2197 }
0x229a   :  { %v2200_v21 = vmul.f32 %v3092_v5, %v2198_v19 }
0x229c   :  { %2203 = vrot.lane.b32.xlu1 %v2200_v21, %s3118_s4 }
0x230e   :  { %v2204_v22 = vpop.permute.xlu1 %2203 }
0x230f   :  { %2955 = vmatmul.mubr.msk.f32.vlgmr.msra.gmra.mxu0 %vm197_vm2, %v2204_v22 }
0x2310   :  { %2976 = vmatprep.mubr.msk.f32.mxu0 %vm3116_vm0, %v3115_v0  ;;  %2969 = vmatpush3.msra.mxu0 %v2406_v50 }
0x2311   :  { %2970 = vmatprep.subr.mxu0 %v3115_v0 }
0x2312   :  { %2971 = vmatpush3.msra.mxu0 %v2405_v45 }
0x2313   :  { %2972 = vmatprep.subr.mxu0 %v3115_v0 }
0x2314   :  { %2973 = vmatpush3.msra.mxu0 %v2404_v57 }
0x2315   :  { %2974 = vmatprep.subr.mxu0 %v3115_v0 }
0x2316   :  { %2975 = vmatpush3.msra.mxu0 %v2403_v59 }
0x23cf   :  { %v2273_v31 = vpop.f32.mrf.mxu0 }
0x23d0   :  { %v2277_v47 = vadd.f32 %v2273_v31, %v1417_v23 }
0x23d1   :  { %v2956_v24 = vpop.f32.mrf.mxu0 }
0x23d2   :  { %3095 = vtanh.f32 %v2277_v47  ;;  %v2548_v26 = vmul.f32 -1.442695, %v2277_v47 }
0x23d4   :  { %3097 = vpow2.f32 %v2548_v26 }
0x23df   :  { %v3096_v25 = vpop.eup %3095 }
0x23e0   :  { %2287 = vrot.lane.b32.xlu0 %v3096_v25, %s3117_s25 }
0x23e1   :  { %v3098_v27 = vpop.eup %3097 }
0x23e2   :  { %v2281_v28 = vadd.f32 1.0, %v3098_v27 }
0x23e4   :  { %3099 = vrcp.f32 %v2281_v28 }
0x23f1   :  { %v3100_v33 = vpop.eup %3099 }
0x23f2   :  { %v2285_v42 = vmul.f32 %v3100_v33, %v2194_v4 }
0x2452   :  { %v2288_v35 = vpop.permute.xlu0 %2287 }
0x2453   :  { %v2290_v36 = vmul.f32 %v3100_v33, %v2288_v35 }
0x2455   :  { %2292 = vrot.lane.b32.xlu1 %v2290_v36, %s3117_s25 }
0x24c7   :  { %v2293_v37 = vpop.permute.xlu1 %2292 }
0x24c8   :  { %v2295_v30 = vadd.f32 %v2293_v37, %v2285_v42 }
0x24ca   :  { %3101 = vtanh.f32 %v2295_v30 }
0x24d7   :  { %v3102_v38 = vpop.eup %3101 }
0x24d8   :  { %2298 = vrot.lane.b32.xlu0 %v3102_v38, %s3117_s25 }
0x254a   :  { %v2299_v39 = vpop.permute.xlu0 %2298 }
0x254b   :  { %v2301_v41 = vmul.f32 %v3100_v33, %v2299_v39 }
0x254d   :  { %2304 = vrot.lane.b32.xlu1 %v2301_v41, %s3118_s4 }
0x25bf   :  { %v2305_v46 = vpop.permute.xlu1 %2304 }
0x25c0   :  { %2966 = vmatmul.mubr.msk.f32.vlgmr.msra.gmra.mxu1 %vm197_vm2, %v2305_v46 }
0x2680   :  { %v2374_v2 = vpop.f32.mrf.mxu1 }
0x2681   :  { %v2378_v58 = vadd.f32 %v2374_v2, %v1591_v48 }
0x2682   :  { %v2967_v7 = vpop.f32.mrf.mxu1 }
0x2683   :  { %3103 = vtanh.f32 %v2378_v58  ;;  %v2550_v8 = vmul.f32 -1.442695, %v2378_v58 }
0x2685   :  { %3105 = vpow2.f32 %v2550_v8 }
0x2690   :  { %v3104_v49 = vpop.eup %3103 }
0x2691   :  { %2388 = vrot.lane.b32.xlu0 %v3104_v49, %s3117_s25 }
0x2692   :  { %v3106_v40 = vpop.eup %3105 }
0x2693   :  { %v2382_v51 = vadd.f32 1.0, %v3106_v40 }
0x2695   :  { %3107 = vrcp.f32 %v2382_v51 }
0x26a2   :  { %v3108_v52 = vpop.eup %3107 }
0x26a3   :  { %v2386_v55 = vmul.f32 %v3108_v52, %v2295_v30 }
0x2703   :  { %v2389_v53 = vpop.permute.xlu0 %2388 }
0x2704   :  { %v2391_v54 = vmul.f32 %v3108_v52, %v2389_v53 }
0x2706   :  { %2393 = vrot.lane.b32.xlu1 %v2391_v54, %s3117_s25 }
0x2778   :  { %v2394_v56 = vpop.permute.xlu1 %2393 }
0x2779   :  { %v2396_v43 = vadd.f32 %v2394_v56, %v2386_v55 }
0x277b   :  { %3109 = vtanh.f32 %v2396_v43 }
0x2788   :  { %v3110_v60 = vpop.eup %3109 }
0x2789   :  { %2399 = vrot.lane.b32.xlu0 %v3110_v60, %s3117_s25 }
0x27fb   :  { %v2400_v61 = vpop.permute.xlu0 %2399 }
0x27fc   :  { %v2402_v62 = vmul.f32 %v3108_v52, %v2400_v61 }
0x27fe   :  { %2415 = vrot.lane.b32.xlu1 %v2402_v62, %s3118_s4 }
0x2870   :  { %v2416_v1 = vpop.permute.xlu1 %2415 }
0x2871   :  { %2977 = vmatmul.mubr.msk.f32.vlgmr.msra.gmra.mxu0 %vm197_vm2, %v2416_v1 }
0x2931   :  { %v2485_v6 = vpop.f32.mrf.mxu0 }
0x2932   :  { %v2486_v29 = vadd.f32 %v2551_v20, %v2485_v6 }
0x2933   :  { %v2978_v32 = vpop.f32.mrf.mxu0 }
0x2934   :  { %2489 = vmax.xlane.f32.xlu0 %v2486_v29 }
0x29bd   :  { %v2490_v0 = vpop.xlane.xlu0 %2489 }
0x29be   :  { %v2491_v34 = vsub.f32 %v2486_v29, %v2490_v0 }
0x29c0   :  { %v2492_v11 = vmul.f32 1.442695, %v2491_v34 }
0x29c2   :  { %3111 = vpow2.f32 %v2492_v11 }
0x29cf   :  { %v3112_v12 = vpop.eup %3111 }
0x29d0   :  { %2494 = vadd.xlane.f32.xlu1 %v3112_v12 }
0x2a59   :  { %v2495_v63 = vpop.xlane.xlu1 %2494 }
0x2a5a   :  { %3113 = vrcp.f32 %v2495_v63 }
0x2a67   :  { %v3114_v13 = vpop.eup %3113 }
0x2a68   :  { %v2497_v14 = vmul.f32 %v3114_v13, %v3112_v12 }
0x2a6a   :  { %2498 = vst [vmem:[%s3705_s9] sm:$0xff] %v2497_v14 }

</bundles_post_ra>
